<compile_context>
chip_gen: v6e
topology: v6e:2x2x1
jax: 0.10.0
libtpu: 0.0.40
codegen_flags: <defaults>
</compile_context>

<pallas_src>
import functools

import jax
import jax.numpy as jnp
from jax.experimental import pallas as pl
from jax.experimental.pallas import tpu as pltpu

_VMEM_LIMIT = 48 * 1024 * 1024  # raised above v5e's 16 MiB scoped default, fits v7x's 64 MiB


# -----------------------------------------------------------------------------
# Pallas kernels
# -----------------------------------------------------------------------------
def _matmul_bias_act_kernel(x_ref, w_ref, b_ref, o_ref, *, act):
    """Fused (TM,K)@(K,N) + bias + optional activation for one M-tile."""
    acc = jnp.dot(x_ref[...], w_ref[...], preferred_element_type=jnp.float32)
    acc = acc + b_ref[...]                      # (TM,N) + (1,N) broadcast
    if act == "relu":
        acc = jnp.maximum(acc, 0.0)
    elif act == "sigmoid":
        acc = jax.nn.sigmoid(acc)
    o_ref[...] = acc.astype(o_ref.dtype)


def pallas_matmul_bias(x, w, b2, act=None, tm=256):
    """x:(M,K) bf16, w:(K,N) bf16, b2:(1,N) f32 -> (M,N) f32. M-tiled (ragged M padded)."""
    M, K = x.shape
    K2, N = w.shape
    assert K == K2, (K, K2)
    tm = max(8, min(tm, ((M + 7) // 8) * 8))
    grid_m = pl.cdiv(M, tm)
    Mp = grid_m * tm
    if Mp != M:                                  # pad ragged last tile (sliced off below)
        x = jnp.pad(x, ((0, Mp - M), (0, 0)))
    flops = 2 * Mp * K * N
    bytes_accessed = Mp * K * 2 + K * N * 2 + N * 4 + Mp * N * 4
    out = pl.pallas_call(
        functools.partial(_matmul_bias_act_kernel, act=act),
        out_shape=jax.ShapeDtypeStruct((Mp, N), jnp.float32),
        grid=(grid_m,),
        in_specs=[
            pl.BlockSpec((tm, K), lambda i: (i, 0)),
            pl.BlockSpec((K, N), lambda i: (0, 0)),
            pl.BlockSpec((1, N), lambda i: (0, 0)),
        ],
        out_specs=pl.BlockSpec((tm, N), lambda i: (i, 0)),
        compiler_params=pltpu.CompilerParams(dimension_semantics=("parallel",),
                                             vmem_limit_bytes=_VMEM_LIMIT),
        cost_estimate=pl.CostEstimate(flops=flops, transcendentals=0,
                                      bytes_accessed=int(bytes_accessed)),
    )(x, w, b2)
    return out[:M] if Mp != M else out


def _conv3x3s2_kernel(x_ref, w_ref, b_ref, o_ref, *, ho, wo, cin, act):
    """3x3 / stride-2 / pad-1 conv for one batch element as ONE K=9*Cin matmul.

    x_ref: (1, Hh, Wh, 4*Cin) bf16 -- space-to-depth packed padded input, channel group
           g = 2*row_phase + col_phase.
    w_ref: (9*Cin, Cout) bf16 tap-major weights.   b_ref: (1, Cout) f32.
    o_ref: (Ho*Wo, Cout) bf16.
    """
    x = x_ref[...]
    wins = []
    for tap in range(9):                         # static unroll; only builds the patch slab
        dy, dx = tap // 3, tap % 3
        g = (dy % 2) * 2 + (dx % 2)              # phase -> channel group of the packed input
        wins.append(x[:, dy // 2: dy // 2 + ho,
                      dx // 2: dx // 2 + wo,
                      g * cin: (g + 1) * cin])   # (1, Ho, Wo, Cin)
    patches = jnp.concatenate(wins, axis=-1).reshape(ho * wo, 9 * cin)
    acc = jnp.dot(patches, w_ref[...], preferred_element_type=jnp.float32)  # single MXU pass
    acc = acc + b_ref[...]
    if act == "relu":
        acc = jnp.maximum(acc, 0.0)
    o_ref[...] = acc.astype(o_ref.dtype)


def pallas_conv3x3_s2(x_nhwc, w_flat, b2, act="relu", out_dtype=jnp.bfloat16):
    """x:(B,H,W,C) NHWC -> (B,Ho,Wo,Cout) bf16; conv 3x3, stride 2, padding 1.

    Wrapper does pad + one contiguous 2x2 space-to-depth transform (same total bytes as
    the input, lane dim raised to 4*Cin); the kernel builds the (M, 9*Cin) patch matrix
    in VMEM and performs a single matmul, so no 9x im2col buffer ever hits HBM.
    """
    B, H, W, C = x_nhwc.shape
    Cout = w_flat.shape[-1]
    assert w_flat.shape[0] == 9 * C, (w_flat.shape, C)
    Ho = (H + 2 - 3) // 2 + 1
    Wo = (W + 2 - 3) // 2 + 1

    xp = jnp.pad(x_nhwc, ((0, 0), (1, 1), (1, 1), (0, 0))).astype(jnp.bfloat16)
    Hp, Wp = H + 2, W + 2
    ph, pw = Hp % 2, Wp % 2
    if ph or pw:                                  # make padded dims even for 2x2 packing
        xp = jnp.pad(xp, ((0, 0), (0, ph), (0, pw), (0, 0)))
    Hh, Wh = (Hp + ph) // 2, (Wp + pw) // 2
    s2d = (xp.reshape(B, Hh, 2, Wh, 2, C)
             .transpose(0, 1, 3, 2, 4, 5)
             .reshape(B, Hh, Wh, 4 * C))          # channel = (2*ry+rx)*C + c

    flops = 2 * (B * Ho * Wo) * (9 * C) * Cout
    bytes_accessed = s2d.size * 2 + w_flat.size * 2 + b2.size * 4 + B * Ho * Wo * Cout * 2

    # TODO(synk): at real RT-DETR resolutions additionally tile Ho rows per grid step
    #             (halo rows via pl.Element index maps) and consider pl.Buffered(3) on the
    #             input stream for v5e/v6e (re-check the 64 MiB VMEM budget before v7x).
    out = pl.pallas_call(
        functools.partial(_conv3x3s2_kernel, ho=Ho, wo=Wo, cin=C, act=act),
        out_shape=jax.ShapeDtypeStruct((B * Ho * Wo, Cout), out_dtype),
        grid=(B,),
        in_specs=[
            pl.BlockSpec((1, Hh, Wh, 4 * C), lambda b: (b, 0, 0, 0)),
            pl.BlockSpec(w_flat.shape, lambda b: (0, 0)),
            pl.BlockSpec(b2.shape, lambda b: (0, 0)),
        ],
        out_specs=pl.BlockSpec((Ho * Wo, Cout), lambda b: (b, 0)),
        compiler_params=pltpu.CompilerParams(dimension_semantics=("parallel",),
                                             vmem_limit_bytes=_VMEM_LIMIT),
        cost_estimate=pl.CostEstimate(flops=flops, transcendentals=0,
                                      bytes_accessed=int(bytes_accessed)),
    )(s2d, w_flat, b2)
    return out.reshape(B, Ho, Wo, Cout)


def _decoder_kernel(f1_ref, f2_ref, w1_ref, b1_ref, w2_ref, b2_ref,
                    q_ref, hw_ref, hb_ref, o_ref, *, scale):
    """Fused decoder for ONE batch element (grid axis over B outside).

    f1_ref:(S1,C1) f2_ref:(S2,C2) bf16; w*:(C*,D) bf16; b*:(1,D) f32; q_ref:(Nq,D) bf16;
    hw_ref:(D,128) bf16 (cls|box padded to 128 lanes); hb_ref:(1,128) f32; o_ref:(Nq,128) f32.
    Per-scale 1x1 projection -> two-block online-softmax cross-attention -> fused head.
    QK^T / PV / head matmuls use bf16 operands with f32 accumulation.
    """
    m1 = jnp.dot(f1_ref[...], w1_ref[...], preferred_element_type=jnp.float32) + b1_ref[...]
    m2 = jnp.dot(f2_ref[...], w2_ref[...], preferred_element_type=jnp.float32) + b2_ref[...]
    m1b = m1.astype(jnp.bfloat16)                 # keys/values for this batch element
    m2b = m2.astype(jnp.bfloat16)
    q = q_ref[...]                                # (Nq, D) bf16, shared learned queries

    dn = (((1,), (1,)), ((), ()))                 # q @ m^T (single transpose per program)
    sc1 = jax.lax.dot_general(q, m1b, dn, preferred_element_type=jnp.float32) * scale
    sc2 = jax.lax.dot_general(q, m2b, dn, preferred_element_type=jnp.float32) * scale

    mx = jnp.maximum(jnp.max(sc1, axis=-1, keepdims=True),
                     jnp.max(sc2, axis=-1, keepdims=True))
    p1 = jnp.exp(sc1 - mx)
    p2 = jnp.exp(sc2 - mx)
    denom = jnp.sum(p1, axis=-1, keepdims=True) + jnp.sum(p2, axis=-1, keepdims=True)
    attn = (jnp.dot(p1.astype(jnp.bfloat16), m1b, preferred_element_type=jnp.float32)
            + jnp.dot(p2.astype(jnp.bfloat16), m2b, preferred_element_type=jnp.float32))
    attn = attn * pl.reciprocal(denom, approx=True)           # EUP slot, otherwise idle

    heads = jnp.dot(attn.astype(jnp.bfloat16), hw_ref[...],
                    preferred_element_type=jnp.float32) + hb_ref[...]   # (Nq, 128)
    o_ref[...] = heads.astype(o_ref.dtype)                    # lane-dense store


# -----------------------------------------------------------------------------
# RT-DETR sub-modules built on the Pallas kernels
# -----------------------------------------------------------------------------
def init_params(key, cin=4, c1=16, c2=32, hidden=32, num_queries=8, num_classes=4):
    ks = jax.random.split(key, 10)

    def w(k, shape, fan_in):
        return jax.random.normal(k, shape, jnp.float32) / jnp.sqrt(float(fan_in))

    head_cols = 128                               # pad [cls|box] head to a lane-dense width
    head_w = jnp.concatenate([w(ks[7], (hidden, num_classes), hidden),
                              w(ks[8], (hidden, 4), hidden)], axis=1)
    head_w = jnp.pad(head_w, ((0, 0), (0, head_cols - (num_classes + 4))))

    params = {
        # backbone: two 3x3/s2 conv stages; weights flattened tap-major to (9*Cin, Cout)
        "bb_w1": w(ks[0], (9, cin, c1), 9 * cin).reshape(9 * cin, c1).astype(jnp.bfloat16),
        "bb_b1": jnp.zeros((1, c1), jnp.float32),
        "bb_w2": w(ks[1], (9, c1, c2), 9 * c1).reshape(9 * c1, c2).astype(jnp.bfloat16),
        "bb_b2": jnp.zeros((1, c2), jnp.float32),
        # encoder: per-scale 1x1 projection + ReLU (output discarded, like the reference)
        "enc_w1": w(ks[2], (c1, hidden), c1).astype(jnp.bfloat16),
        "enc_b1": jnp.zeros((1, hidden), jnp.float32),
        "enc_w2": w(ks[3], (c2, hidden), c2).astype(jnp.bfloat16),
        "enc_b2": jnp.zeros((1, hidden), jnp.float32),
        # decoder: per-scale input projection, learned queries, fused padded [cls|box] head
        "dec_w1": w(ks[4], (c1, hidden), c1).astype(jnp.bfloat16),
        "dec_b1": jnp.zeros((1, hidden), jnp.float32),
        "dec_w2": w(ks[5], (c2, hidden), c2).astype(jnp.bfloat16),
        "dec_b2": jnp.zeros((1, hidden), jnp.float32),
        "queries": (0.1 * jax.random.normal(ks[6], (num_queries, hidden),
                                            jnp.float32)).astype(jnp.bfloat16),
        "head_w": head_w.astype(jnp.bfloat16),
        "head_b": jnp.zeros((1, head_cols), jnp.float32),
    }
    dims = dict(cin=cin, c1=c1, c2=c2, hidden=hidden, num_queries=num_queries,
                num_classes=num_classes, head_cols=head_cols)
    return params, dims


def backbone(x_nhwc, p):
    """Two conv 3x3 / stride 2 / ReLU stages -> multi-scale features [f1, f2] (NHWC, bf16)."""
    f1 = pallas_conv3x3_s2(x_nhwc, p["bb_w1"], p["bb_b1"], act="relu")
    f2 = pallas_conv3x3_s2(f1, p["bb_w2"], p["bb_b2"], act="relu")
    return [f1, f2]


def encoder(raw_feats, p, dims):
    """Per-scale 1x1 projection + ReLU. Result is unused (mirrors `_ = self.encoder(...)`);
    under jax.jit this whole branch is dead-code-eliminated."""
    outs = []
    for f, (w, b) in zip(raw_feats, [(p["enc_w1"], p["enc_b1"]), (p["enc_w2"], p["enc_b2"])]):
        B, H, W, C = f.shape
        y = pallas_matmul_bias(f.reshape(B * H * W, C), w, b, act="relu")
        outs.append(y.reshape(B, H, W, dims["hidden"]))
    return outs


def decoder(raw_feats, p, dims, targets=None):
    """One fused Pallas call per forward: projections -> cross-attention -> fused heads,
    batched over a 'parallel' grid axis (one program per image)."""
    f1, f2 = raw_feats                            # NHWC bf16 straight from the backbone
    B, H1, W1, C1 = f1.shape
    _, H2, W2, C2 = f2.shape
    hidden, nq, nc = dims["hidden"], dims["num_queries"], dims["num_classes"]
    hc = dims["head_cols"]
    s1, s2 = H1 * W1, H2 * W2

    f1_flat = f1.reshape(B * s1, C1)              # already bf16, no cast / extra HBM pass
    f2_flat = f2.reshape(B * s2, C2)

    flops = B * (2 * s1 * C1 * hidden + 2 * s2 * C2 * hidden
                 + 4 * nq * hidden * (s1 + s2) + 2 * nq * hidden * hc)
    bytes_accessed = (f1_flat.size * 2 + f2_flat.size * 2
                      + (p["dec_w1"].size + p["dec_w2"].size + p["queries"].size
                         + p["head_w"].size) * 2
                      + (p["dec_b1"].size + p["dec_b2"].size + p["head_b"].size) * 4
                      + B * nq * hc * 4)

    head_out = pl.pallas_call(
        functools.partial(_decoder_kernel, scale=1.0 / float(hidden) ** 0.5),
        out_shape=jax.ShapeDtypeStruct((B * nq, hc), jnp.float32),
        grid=(B,),
        in_specs=[
            pl.BlockSpec((s1, C1), lambda b: (b, 0)),
            pl.BlockSpec((s2, C2), lambda b: (b, 0)),
            pl.BlockSpec(p["dec_w1"].shape, lambda b: (0, 0)),
            pl.BlockSpec(p["dec_b1"].shape, lambda b: (0, 0)),
            pl.BlockSpec(p["dec_w2"].shape, lambda b: (0, 0)),
            pl.BlockSpec(p["dec_b2"].shape, lambda b: (0, 0)),
            pl.BlockSpec(p["queries"].shape, lambda b: (0, 0)),
            pl.BlockSpec(p["head_w"].shape, lambda b: (0, 0)),
            pl.BlockSpec(p["head_b"].shape, lambda b: (0, 0)),
        ],
        out_specs=pl.BlockSpec((nq, hc), lambda b: (b, 0)),
        compiler_params=pltpu.CompilerParams(dimension_semantics=("parallel",),
                                             vmem_limit_bytes=_VMEM_LIMIT),
        cost_estimate=pl.CostEstimate(flops=flops, transcendentals=B * nq * (s1 + s2),
                                      bytes_accessed=int(bytes_accessed)),
    )(f1_flat, f2_flat, p["dec_w1"], p["dec_b1"], p["dec_w2"], p["dec_b2"],
      p["queries"], p["head_w"], p["head_b"])

    head_out = head_out.reshape(B, nq, hc)
    return {
        "pred_logits": head_out[..., :nc],
        "pred_boxes": jax.nn.sigmoid(head_out[..., nc:nc + 4]),  # fused into the jit epilogue
    }


def forward(params, x_nchw, *, dims):
    x = jnp.transpose(x_nchw, (0, 2, 3, 1))       # NCHW -> NHWC (fused under jit)
    raw_feats = backbone(x, params)
    _ = encoder(raw_feats, params, dims)          # discarded as in reference -> DCE'd under jit
    out = decoder(raw_feats, params, dims)
    return out


class RTDETRPallas:
    """Mirror of RTDETR.forward (eval mode: multi_scale branch is inactive)."""

    def __init__(self, params, dims, multi_scale=None):
        self.params = params
        self.dims = dims
        self.multi_scale = multi_scale
        self.training = False  # eval mode; deploy()/convert_to_deploy is a no-op here
        # TODO(synk): training-time multi_scale F.interpolate branch not implemented (eval path only).
        self._forward = jax.jit(functools.partial(forward, dims=dims))

    def __call__(self, x_nchw, targets=None):
        return self._forward(self.params, x_nchw)


# -----------------------------------------------------------------------------
# Reference conv (straightforward strided slices, f32) for a receptive-field sanity check
# -----------------------------------------------------------------------------
def conv3x3s2_reference(x_nhwc, w_flat, b2):
    B, H, W, C = x_nhwc.shape
    Cout = w_flat.shape[-1]
    w9 = w_flat.astype(jnp.float32).reshape(9, C, Cout)
    xp = jnp.pad(x_nhwc.astype(jnp.float32), ((0, 0), (1, 1), (1, 1), (0, 0)))
    Ho = (H + 2 - 3) // 2 + 1
    Wo = (W + 2 - 3) // 2 + 1
    acc = jnp.zeros((B, Ho, Wo, Cout), jnp.float32)
    for tap in range(9):
        dy, dx = tap // 3, tap % 3
        win = xp[:, dy:dy + 2 * Ho:2, dx:dx + 2 * Wo:2, :]
        acc = acc + jnp.einsum("bhwc,cd->bhwd", win, w9[tap])
    acc = acc + b2.reshape(1, 1, 1, Cout)
    return jnp.maximum(acc, 0.0)


# -----------------------------------------------------------------------------
# Main
# -----------------------------------------------------------------------------
if __name__ == "__main__":
    key = jax.random.PRNGKey(0)
    pkey, xkey = jax.random.split(key)

    params, dims = init_params(pkey, cin=4, c1=16, c2=32, hidden=32,
                               num_queries=8, num_classes=4)
    x = jax.random.normal(xkey, (2, 4, 16, 16), dtype=jnp.float32)   # NCHW like PyTorch

    model = RTDETRPallas(params, dims, multi_scale=None)
    out = model(x)

    jax.block_until_ready(out["pred_logits"])
    jax.block_until_ready(out["pred_boxes"])
    assert out["pred_logits"].shape == (2, 8, 4)
    assert out["pred_boxes"].shape == (2, 8, 4)

    # Stage-1 conv sanity check (phase/space-to-depth index math vs. plain strided slices).
    x_nhwc = jnp.transpose(x, (0, 2, 3, 1))
    got = pallas_conv3x3_s2(x_nhwc, params["bb_w1"], params["bb_b1"],
                            act="relu").astype(jnp.float32)
    ref = conv3x3s2_reference(x_nhwc, params["bb_w1"], params["bb_b1"])
    max_diff = float(jnp.max(jnp.abs(got - ref)))
    assert max_diff < 0.12, f"conv mismatch: {max_diff}"

    print("KERNEL_OK")
</pallas_src>

<mosaic_0001>
module attributes {stable_mosaic.version = 11 : i64} {
  func.func @_conv3x3s2_kernel(%arg0: i32, %arg1: memref<1x9x9x16xbf16, #tpu.memory_space<vmem>>, %arg2: memref<36x16xbf16, #tpu.memory_space<vmem>>, %arg3: memref<1x16xf32, #tpu.memory_space<vmem>>, %arg4: memref<64x16xbf16, #tpu.memory_space<vmem>>) attributes {dimension_semantics = [#tpu.dimension_semantics<parallel>], iteration_bounds = array<i64: 2>, scalar_prefetch = 0 : i64, scratch_operands = 0 : i64, tpu.core_type = #tpu.core_type<tc>, window_params = [{transform_indices = @transform_0, window_bounds = array<i64: 1, 9, 9, 16>}, {pipeline_mode = #tpu.pipeline_mode<synchronous>, transform_indices = @transform_1, window_bounds = array<i64: 36, 16>}, {pipeline_mode = #tpu.pipeline_mode<synchronous>, transform_indices = @transform_2, window_bounds = array<i64: 1, 16>}, {transform_indices = @transform_3, window_bounds = array<i64: 64, 16>}]} {
    %c0 = arith.constant 0 : index
    %c0_0 = arith.constant 0 : index
    %c0_1 = arith.constant 0 : index
    %c0_2 = arith.constant 0 : index
    %0 = vector.load %arg1[%c0, %c0_0, %c0_1, %c0_2] : memref<1x9x9x16xbf16, #tpu.memory_space<vmem>>, vector<1x9x9x16xbf16>
    %1 = vector.extract_strided_slice %0 {offsets = [0, 0, 0, 0], sizes = [1, 8, 8, 4], strides = [1, 1, 1, 1]} : vector<1x9x9x16xbf16> to vector<1x8x8x4xbf16>
    %2 = vector.extract_strided_slice %0 {offsets = [0, 0, 0, 4], sizes = [1, 8, 8, 4], strides = [1, 1, 1, 1]} : vector<1x9x9x16xbf16> to vector<1x8x8x4xbf16>
    %3 = vector.extract_strided_slice %0 {offsets = [0, 0, 1, 0], sizes = [1, 8, 8, 4], strides = [1, 1, 1, 1]} : vector<1x9x9x16xbf16> to vector<1x8x8x4xbf16>
    %4 = vector.extract_strided_slice %0 {offsets = [0, 0, 0, 8], sizes = [1, 8, 8, 4], strides = [1, 1, 1, 1]} : vector<1x9x9x16xbf16> to vector<1x8x8x4xbf16>
    %5 = vector.extract_strided_slice %0 {offsets = [0, 0, 0, 12], sizes = [1, 8, 8, 4], strides = [1, 1, 1, 1]} : vector<1x9x9x16xbf16> to vector<1x8x8x4xbf16>
    %6 = vector.extract_strided_slice %0 {offsets = [0, 0, 1, 8], sizes = [1, 8, 8, 4], strides = [1, 1, 1, 1]} : vector<1x9x9x16xbf16> to vector<1x8x8x4xbf16>
    %7 = vector.extract_strided_slice %0 {offsets = [0, 1, 0, 0], sizes = [1, 8, 8, 4], strides = [1, 1, 1, 1]} : vector<1x9x9x16xbf16> to vector<1x8x8x4xbf16>
    %8 = vector.extract_strided_slice %0 {offsets = [0, 1, 0, 4], sizes = [1, 8, 8, 4], strides = [1, 1, 1, 1]} : vector<1x9x9x16xbf16> to vector<1x8x8x4xbf16>
    %9 = vector.extract_strided_slice %0 {offsets = [0, 1, 1, 0], sizes = [1, 8, 8, 4], strides = [1, 1, 1, 1]} : vector<1x9x9x16xbf16> to vector<1x8x8x4xbf16>
    %10 = tpu.concatenate %1, %2, %3, %4, %5, %6, %7, %8, %9 in 3 : vector<1x8x8x4xbf16>, vector<1x8x8x4xbf16>, vector<1x8x8x4xbf16>, vector<1x8x8x4xbf16>, vector<1x8x8x4xbf16>, vector<1x8x8x4xbf16>, vector<1x8x8x4xbf16>, vector<1x8x8x4xbf16>, vector<1x8x8x4xbf16> -> vector<1x8x8x36xbf16>
    %11 = vector.shape_cast %10 : vector<1x8x8x36xbf16> to vector<64x36xbf16>
    %c0_3 = arith.constant 0 : index
    %c0_4 = arith.constant 0 : index
    %12 = vector.load %arg2[%c0_3, %c0_4] : memref<36x16xbf16, #tpu.memory_space<vmem>>, vector<36x16xbf16>
    %cst = arith.constant dense<0.000000e+00> : vector<64x16xf32>
    %13 = tpu.matmul %11, %12, %cst {dimension_numbers = #tpu.dot_dimension_numbers<[1], [0], [0], [1], [0, 0, 1, 1], [], []>} : vector<64x36xbf16>, vector<36x16xbf16>, vector<64x16xf32> -> vector<64x16xf32>
    %c0_5 = arith.constant 0 : index
    %c0_6 = arith.constant 0 : index
    %14 = vector.load %arg3[%c0_5, %c0_6] : memref<1x16xf32, #tpu.memory_space<vmem>>, vector<1x16xf32>
    %15 = vector.broadcast %14 : vector<1x16xf32> to vector<64x16xf32>
    %16 = arith.addf %13, %15 : vector<64x16xf32>
    %cst_7 = arith.constant 0.000000e+00 : f32
    %17 = vector.broadcast %cst_7 : f32 to vector<64x16xf32>
    %18 = arith.maximumf %16, %17 : vector<64x16xf32>
    %19 = arith.truncf %18 : vector<64x16xf32> to vector<64x16xbf16>
    %c0_8 = arith.constant 0 : index
    %c0_9 = arith.constant 0 : index
    %20 = vector.load %arg4[%c0_8, %c0_9] : memref<64x16xbf16, #tpu.memory_space<vmem>>, vector<64x16xbf16>
    tpu.vector_store %arg4[%c0_8, %c0_9], %19 {strides = array<i32>} : memref<64x16xbf16, #tpu.memory_space<vmem>>, vector<64x16xbf16>,
    return
  }
  func.func @transform_0(%arg0: i32) -> (i32, i32, i32, i32) {
    %c0_i32 = arith.constant 0 : i32
    %c0_i32_0 = arith.constant 0 : i32
    %c0_i32_1 = arith.constant 0 : i32
    %c0_i32_2 = arith.constant 0 : i32
    return %arg0, %c0_i32, %c0_i32_0, %c0_i32_1 : i32, i32, i32, i32
  }
  func.func @transform_1(%arg0: i32) -> (i32, i32) {
    %c0_i32 = arith.constant 0 : i32
    %c0_i32_0 = arith.constant 0 : i32
    %c0_i32_1 = arith.constant 0 : i32
    return %c0_i32, %c0_i32_0 : i32, i32
  }
  func.func @transform_2(%arg0: i32) -> (i32, i32) {
    %c0_i32 = arith.constant 0 : i32
    %c0_i32_0 = arith.constant 0 : i32
    %c0_i32_1 = arith.constant 0 : i32
    return %c0_i32, %c0_i32_0 : i32, i32
  }
  func.func @transform_3(%arg0: i32) -> (i32, i32) {
    %c0_i32 = arith.constant 0 : i32
    %c0_i32_0 = arith.constant 0 : i32
    return %arg0, %c0_i32 : i32, i32
  }
}

module attributes {stable_mosaic.version = 11 : i64} {
  func.func @_decoder_kernel(%arg0: i32, %arg1: memref<64x16xbf16, #tpu.memory_space<vmem>>, %arg2: memref<16x32xbf16, #tpu.memory_space<vmem>>, %arg3: memref<16x32xbf16, #tpu.memory_space<vmem>>, %arg4: memref<1x32xf32, #tpu.memory_space<vmem>>, %arg5: memref<32x32xbf16, #tpu.memory_space<vmem>>, %arg6: memref<1x32xf32, #tpu.memory_space<vmem>>, %arg7: memref<8x32xbf16, #tpu.memory_space<vmem>>, %arg8: memref<32x128xbf16, #tpu.memory_space<vmem>>, %arg9: memref<1x128xf32, #tpu.memory_space<vmem>>, %arg10: memref<8x128xf32, #tpu.memory_space<vmem>>) attributes {dimension_semantics = [#tpu.dimension_semantics<parallel>], iteration_bounds = array<i64: 2>, scalar_prefetch = 0 : i64, scratch_operands = 0 : i64, tpu.core_type = #tpu.core_type<tc>, window_params = [{transform_indices = @transform_0, window_bounds = array<i64: 64, 16>}, {transform_indices = @transform_1, window_bounds = array<i64: 16, 32>}, {pipeline_mode = #tpu.pipeline_mode<synchronous>, transform_indices = @transform_2, window_bounds = array<i64: 16, 32>}, {pipeline_mode = #tpu.pipeline_mode<synchronous>, transform_indices = @transform_3, window_bounds = array<i64: 1, 32>}, {pipeline_mode = #tpu.pipeline_mode<synchronous>, transform_indices = @transform_4, window_bounds = array<i64: 32, 32>}, {pipeline_mode = #tpu.pipeline_mode<synchronous>, transform_indices = @transform_5, window_bounds = array<i64: 1, 32>}, {pipeline_mode = #tpu.pipeline_mode<synchronous>, transform_indices = @transform_6, window_bounds = array<i64: 8, 32>}, {pipeline_mode = #tpu.pipeline_mode<synchronous>, transform_indices = @transform_7, window_bounds = array<i64: 32, 128>}, {pipeline_mode = #tpu.pipeline_mode<synchronous>, transform_indices = @transform_8, window_bounds = array<i64: 1, 128>}, {transform_indices = @transform_9, window_bounds = array<i64: 8, 128>}]} {
    %c0 = arith.constant 0 : index
    %c0_0 = arith.constant 0 : index
    %0 = vector.load %arg1[%c0, %c0_0] : memref<64x16xbf16, #tpu.memory_space<vmem>>, vector<64x16xbf16>
    %c0_1 = arith.constant 0 : index
    %c0_2 = arith.constant 0 : index
    %1 = vector.load %arg3[%c0_1, %c0_2] : memref<16x32xbf16, #tpu.memory_space<vmem>>, vector<16x32xbf16>
    %cst = arith.constant dense<0.000000e+00> : vector<64x32xf32>
    %2 = tpu.matmul %0, %1, %cst {dimension_numbers = #tpu.dot_dimension_numbers<[1], [0], [0], [1], [0, 0, 1, 1], [], []>} : vector<64x16xbf16>, vector<16x32xbf16>, vector<64x32xf32> -> vector<64x32xf32>
    %c0_3 = arith.constant 0 : index
    %c0_4 = arith.constant 0 : index
    %3 = vector.load %arg4[%c0_3, %c0_4] : memref<1x32xf32, #tpu.memory_space<vmem>>, vector<1x32xf32>
    %4 = vector.broadcast %3 : vector<1x32xf32> to vector<64x32xf32>
    %5 = arith.addf %2, %4 : vector<64x32xf32>
    %c0_5 = arith.constant 0 : index
    %c0_6 = arith.constant 0 : index
    %6 = vector.load %arg2[%c0_5, %c0_6] : memref<16x32xbf16, #tpu.memory_space<vmem>>, vector<16x32xbf16>
    %c0_7 = arith.constant 0 : index
    %c0_8 = arith.constant 0 : index
    %7 = vector.load %arg5[%c0_7, %c0_8] : memref<32x32xbf16, #tpu.memory_space<vmem>>, vector<32x32xbf16>
    %cst_9 = arith.constant dense<0.000000e+00> : vector<16x32xf32>
    %8 = tpu.matmul %6, %7, %cst_9 {dimension_numbers = #tpu.dot_dimension_numbers<[1], [0], [0], [1], [0, 0, 1, 1], [], []>} : vector<16x32xbf16>, vector<32x32xbf16>, vector<16x32xf32> -> vector<16x32xf32>
    %c0_10 = arith.constant 0 : index
    %c0_11 = arith.constant 0 : index
    %9 = vector.load %arg6[%c0_10, %c0_11] : memref<1x32xf32, #tpu.memory_space<vmem>>, vector<1x32xf32>
    %10 = vector.broadcast %9 : vector<1x32xf32> to vector<16x32xf32>
    %11 = arith.addf %8, %10 : vector<16x32xf32>
    %12 = arith.truncf %5 : vector<64x32xf32> to vector<64x32xbf16>
    %13 = arith.truncf %11 : vector<16x32xf32> to vector<16x32xbf16>
    %c0_12 = arith.constant 0 : index
    %c0_13 = arith.constant 0 : index
    %14 = vector.load %arg7[%c0_12, %c0_13] : memref<8x32xbf16, #tpu.memory_space<vmem>>, vector<8x32xbf16>
    %cst_14 = arith.constant dense<0.000000e+00> : vector<8x64xf32>
    %15 = tpu.matmul %14, %12, %cst_14 {dimension_numbers = #tpu.dot_dimension_numbers<[1], [1], [0], [0], [0, 0, 1, 0], [], []>} : vector<8x32xbf16>, vector<64x32xbf16>, vector<8x64xf32> -> vector<8x64xf32>
    %cst_15 = arith.constant 0.176776692 : f32
    %16 = vector.broadcast %cst_15 : f32 to vector<8x64xf32>
    %17 = arith.mulf %15, %16 : vector<8x64xf32>
    %cst_16 = arith.constant dense<0.000000e+00> : vector<8x16xf32>
    %18 = tpu.matmul %14, %13, %cst_16 {dimension_numbers = #tpu.dot_dimension_numbers<[1], [1], [0], [0], [0, 0, 1, 0], [], []>} : vector<8x32xbf16>, vector<16x32xbf16>, vector<8x16xf32> -> vector<8x16xf32>
    %cst_17 = arith.constant 0.176776692 : f32
    %19 = vector.broadcast %cst_17 : f32 to vector<8x16xf32>
    %20 = arith.mulf %18, %19 : vector<8x16xf32>
    %cst_18 = arith.constant dense<0xFF800000> : vector<8xf32>
    %21 = vector.multi_reduction <maximumf>, %17, %cst_18 [1] : vector<8x64xf32> to vector<8xf32>
    %22 = vector.shape_cast %21 : vector<8xf32> to vector<8x1xf32>
    %cst_19 = arith.constant dense<0xFF800000> : vector<8xf32>
    %23 = vector.multi_reduction <maximumf>, %20, %cst_19 [1] : vector<8x16xf32> to vector<8xf32>
    %24 = vector.shape_cast %23 : vector<8xf32> to vector<8x1xf32>
    %25 = arith.maximumf %22, %24 : vector<8x1xf32>
    %26 = vector.broadcast %25 : vector<8x1xf32> to vector<8x64xf32>
    %27 = arith.subf %17, %26 : vector<8x64xf32>
    %28 = math.exp %27 : vector<8x64xf32>
    %29 = vector.broadcast %25 : vector<8x1xf32> to vector<8x16xf32>
    %30 = arith.subf %20, %29 : vector<8x16xf32>
    %31 = math.exp %30 : vector<8x16xf32>
    %cst_20 = arith.constant dense<0.000000e+00> : vector<8xf32>
    %32 = vector.multi_reduction <add>, %28, %cst_20 [1] : vector<8x64xf32> to vector<8xf32>
    %33 = vector.shape_cast %32 : vector<8xf32> to vector<8x1xf32>
    %cst_21 = arith.constant dense<0.000000e+00> : vector<8xf32>
    %34 = vector.multi_reduction <add>, %31, %cst_21 [1] : vector<8x16xf32> to vector<8xf32>
    %35 = vector.shape_cast %34 : vector<8xf32> to vector<8x1xf32>
    %36 = arith.addf %33, %35 : vector<8x1xf32>
    %37 = arith.truncf %28 : vector<8x64xf32> to vector<8x64xbf16>
    %cst_22 = arith.constant dense<0.000000e+00> : vector<8x32xf32>
    %38 = tpu.matmul %37, %12, %cst_22 {dimension_numbers = #tpu.dot_dimension_numbers<[1], [0], [0], [1], [0, 0, 1, 1], [], []>} : vector<8x64xbf16>, vector<64x32xbf16>, vector<8x32xf32> -> vector<8x32xf32>
    %39 = arith.truncf %31 : vector<8x16xf32> to vector<8x16xbf16>
    %cst_23 = arith.constant dense<0.000000e+00> : vector<8x32xf32>
    %40 = tpu.matmul %39, %13, %cst_23 {dimension_numbers = #tpu.dot_dimension_numbers<[1], [0], [0], [1], [0, 0, 1, 1], [], []>} : vector<8x16xbf16>, vector<16x32xbf16>, vector<8x32xf32> -> vector<8x32xf32>
    %41 = arith.addf %38, %40 : vector<8x32xf32>
    %42 = tpu.reciprocal %36 {approx = true} : vector<8x1xf32> -> vector<8x1xf32>
    %43 = vector.broadcast %42 : vector<8x1xf32> to vector<8x32xf32>
    %44 = arith.mulf %41, %43 : vector<8x32xf32>
    %45 = arith.truncf %44 : vector<8x32xf32> to vector<8x32xbf16>
    %c0_24 = arith.constant 0 : index
    %c0_25 = arith.constant 0 : index
    %46 = vector.load %arg8[%c0_24, %c0_25] : memref<32x128xbf16, #tpu.memory_space<vmem>>, vector<32x128xbf16>
    %cst_26 = arith.constant dense<0.000000e+00> : vector<8x128xf32>
    %47 = tpu.matmul %45, %46, %cst_26 {dimension_numbers = #tpu.dot_dimension_numbers<[1], [0], [0], [1], [0, 0, 1, 1], [], []>} : vector<8x32xbf16>, vector<32x128xbf16>, vector<8x128xf32> -> vector<8x128xf32>
    %c0_27 = arith.constant 0 : index
    %c0_28 = arith.constant 0 : index
    %48 = vector.load %arg9[%c0_27, %c0_28] : memref<1x128xf32, #tpu.memory_space<vmem>>, vector<1x128xf32>
    %49 = vector.broadcast %48 : vector<1x128xf32> to vector<8x128xf32>
    %50 = arith.addf %47, %49 : vector<8x128xf32>
    %c0_29 = arith.constant 0 : index
    %c0_30 = arith.constant 0 : index
    %51 = vector.load %arg10[%c0_29, %c0_30] : memref<8x128xf32, #tpu.memory_space<vmem>>, vector<8x128xf32>
    tpu.vector_store %arg10[%c0_29, %c0_30], %50 {strides = array<i32>} : memref<8x128xf32, #tpu.memory_space<vmem>>, vector<8x128xf32>,
    return
  }
  func.func @transform_0(%arg0: i32) -> (i32, i32) {
    %c0_i32 = arith.constant 0 : i32
    %c0_i32_0 = arith.constant 0 : i32
    return %arg0, %c0_i32 : i32, i32
  }
  func.func @transform_1(%arg0: i32) -> (i32, i32) {
    %c0_i32 = arith.constant 0 : i32
    %c0_i32_0 = arith.constant 0 : i32
    return %arg0, %c0_i32 : i32, i32
  }
  func.func @transform_2(%arg0: i32) -> (i32, i32) {
    %c0_i32 = arith.constant 0 : i32
    %c0_i32_0 = arith.constant 0 : i32
    %c0_i32_1 = arith.constant 0 : i32
    return %c0_i32, %c0_i32_0 : i32, i32
  }
  func.func @transform_3(%arg0: i32) -> (i32, i32) {
    %c0_i32 = arith.constant 0 : i32
    %c0_i32_0 = arith.constant 0 : i32
    %c0_i32_1 = arith.constant 0 : i32
    return %c0_i32, %c0_i32_0 : i32, i32
  }
  func.func @transform_4(%arg0: i32) -> (i32, i32) {
    %c0_i32 = arith.constant 0 : i32
    %c0_i32_0 = arith.constant 0 : i32
    %c0_i32_1 = arith.constant 0 : i32
    return %c0_i32, %c0_i32_0 : i32, i32
  }
  func.func @transform_5(%arg0: i32) -> (i32, i32) {
    %c0_i32 = arith.constant 0 : i32
    %c0_i32_0 = arith.constant 0 : i32
    %c0_i32_1 = arith.constant 0 : i32
    return %c0_i32, %c0_i32_0 : i32, i32
  }
  func.func @transform_6(%arg0: i32) -> (i32, i32) {
    %c0_i32 = arith.constant 0 : i32
    %c0_i32_0 = arith.constant 0 : i32
    %c0_i32_1 = arith.constant 0 : i32
    return %c0_i32, %c0_i32_0 : i32, i32
  }
  func.func @transform_7(%arg0: i32) -> (i32, i32) {
    %c0_i32 = arith.constant 0 : i32
    %c0_i32_0 = arith.constant 0 : i32
    %c0_i32_1 = arith.constant 0 : i32
    return %c0_i32, %c0_i32_0 : i32, i32
  }
  func.func @transform_8(%arg0: i32) -> (i32, i32) {
    %c0_i32 = arith.constant 0 : i32
    %c0_i32_0 = arith.constant 0 : i32
    %c0_i32_1 = arith.constant 0 : i32
    return %c0_i32, %c0_i32_0 : i32, i32
  }
  func.func @transform_9(%arg0: i32) -> (i32, i32) {
    %c0_i32 = arith.constant 0 : i32
    %c0_i32_0 = arith.constant 0 : i32
    return %arg0, %c0_i32 : i32, i32
  }
}

module attributes {stable_mosaic.version = 11 : i64} {
  func.func @_conv3x3s2_kernel(%arg0: i32, %arg1: memref<1x5x5x64xbf16, #tpu.memory_space<vmem>>, %arg2: memref<144x32xbf16, #tpu.memory_space<vmem>>, %arg3: memref<1x32xf32, #tpu.memory_space<vmem>>, %arg4: memref<16x32xbf16, #tpu.memory_space<vmem>>) attributes {dimension_semantics = [#tpu.dimension_semantics<parallel>], iteration_bounds = array<i64: 2>, scalar_prefetch = 0 : i64, scratch_operands = 0 : i64, tpu.core_type = #tpu.core_type<tc>, window_params = [{transform_indices = @transform_0, window_bounds = array<i64: 1, 5, 5, 64>}, {pipeline_mode = #tpu.pipeline_mode<synchronous>, transform_indices = @transform_1, window_bounds = array<i64: 144, 32>}, {pipeline_mode = #tpu.pipeline_mode<synchronous>, transform_indices = @transform_2, window_bounds = array<i64: 1, 32>}, {transform_indices = @transform_3, window_bounds = array<i64: 16, 32>}]} {
    %c0 = arith.constant 0 : index
    %c0_0 = arith.constant 0 : index
    %c0_1 = arith.constant 0 : index
    %c0_2 = arith.constant 0 : index
    %0 = vector.load %arg1[%c0, %c0_0, %c0_1, %c0_2] : memref<1x5x5x64xbf16, #tpu.memory_space<vmem>>, vector<1x5x5x64xbf16>
    %1 = vector.extract_strided_slice %0 {offsets = [0, 0, 0, 0], sizes = [1, 4, 4, 16], strides = [1, 1, 1, 1]} : vector<1x5x5x64xbf16> to vector<1x4x4x16xbf16>
    %2 = vector.extract_strided_slice %0 {offsets = [0, 0, 0, 16], sizes = [1, 4, 4, 16], strides = [1, 1, 1, 1]} : vector<1x5x5x64xbf16> to vector<1x4x4x16xbf16>
    %3 = vector.extract_strided_slice %0 {offsets = [0, 0, 1, 0], sizes = [1, 4, 4, 16], strides = [1, 1, 1, 1]} : vector<1x5x5x64xbf16> to vector<1x4x4x16xbf16>
    %4 = vector.extract_strided_slice %0 {offsets = [0, 0, 0, 32], sizes = [1, 4, 4, 16], strides = [1, 1, 1, 1]} : vector<1x5x5x64xbf16> to vector<1x4x4x16xbf16>
    %5 = vector.extract_strided_slice %0 {offsets = [0, 0, 0, 48], sizes = [1, 4, 4, 16], strides = [1, 1, 1, 1]} : vector<1x5x5x64xbf16> to vector<1x4x4x16xbf16>
    %6 = vector.extract_strided_slice %0 {offsets = [0, 0, 1, 32], sizes = [1, 4, 4, 16], strides = [1, 1, 1, 1]} : vector<1x5x5x64xbf16> to vector<1x4x4x16xbf16>
    %7 = vector.extract_strided_slice %0 {offsets = [0, 1, 0, 0], sizes = [1, 4, 4, 16], strides = [1, 1, 1, 1]} : vector<1x5x5x64xbf16> to vector<1x4x4x16xbf16>
    %8 = vector.extract_strided_slice %0 {offsets = [0, 1, 0, 16], sizes = [1, 4, 4, 16], strides = [1, 1, 1, 1]} : vector<1x5x5x64xbf16> to vector<1x4x4x16xbf16>
    %9 = vector.extract_strided_slice %0 {offsets = [0, 1, 1, 0], sizes = [1, 4, 4, 16], strides = [1, 1, 1, 1]} : vector<1x5x5x64xbf16> to vector<1x4x4x16xbf16>
    %10 = tpu.concatenate %1, %2, %3, %4, %5, %6, %7, %8, %9 in 3 : vector<1x4x4x16xbf16>, vector<1x4x4x16xbf16>, vector<1x4x4x16xbf16>, vector<1x4x4x16xbf16>, vector<1x4x4x16xbf16>, vector<1x4x4x16xbf16>, vector<1x4x4x16xbf16>, vector<1x4x4x16xbf16>, vector<1x4x4x16xbf16> -> vector<1x4x4x144xbf16>
    %11 = vector.shape_cast %10 : vector<1x4x4x144xbf16> to vector<16x144xbf16>
    %c0_3 = arith.constant 0 : index
    %c0_4 = arith.constant 0 : index
    %12 = vector.load %arg2[%c0_3, %c0_4] : memref<144x32xbf16, #tpu.memory_space<vmem>>, vector<144x32xbf16>
    %cst = arith.constant dense<0.000000e+00> : vector<16x32xf32>
    %13 = tpu.matmul %11, %12, %cst {dimension_numbers = #tpu.dot_dimension_numbers<[1], [0], [0], [1], [0, 0, 1, 1], [], []>} : vector<16x144xbf16>, vector<144x32xbf16>, vector<16x32xf32> -> vector<16x32xf32>
    %c0_5 = arith.constant 0 : index
    %c0_6 = arith.constant 0 : index
    %14 = vector.load %arg3[%c0_5, %c0_6] : memref<1x32xf32, #tpu.memory_space<vmem>>, vector<1x32xf32>
    %15 = vector.broadcast %14 : vector<1x32xf32> to vector<16x32xf32>
    %16 = arith.addf %13, %15 : vector<16x32xf32>
    %cst_7 = arith.constant 0.000000e+00 : f32
    %17 = vector.broadcast %cst_7 : f32 to vector<16x32xf32>
    %18 = arith.maximumf %16, %17 : vector<16x32xf32>
    %19 = arith.truncf %18 : vector<16x32xf32> to vector<16x32xbf16>
    %c0_8 = arith.constant 0 : index
    %c0_9 = arith.constant 0 : index
    %20 = vector.load %arg4[%c0_8, %c0_9] : memref<16x32xbf16, #tpu.memory_space<vmem>>, vector<16x32xbf16>
    tpu.vector_store %arg4[%c0_8, %c0_9], %19 {strides = array<i32>} : memref<16x32xbf16, #tpu.memory_space<vmem>>, vector<16x32xbf16>,
    return
  }
  func.func @transform_0(%arg0: i32) -> (i32, i32, i32, i32) {
    %c0_i32 = arith.constant 0 : i32
    %c0_i32_0 = arith.constant 0 : i32
    %c0_i32_1 = arith.constant 0 : i32
    %c0_i32_2 = arith.constant 0 : i32
    return %arg0, %c0_i32, %c0_i32_0, %c0_i32_1 : i32, i32, i32, i32
  }
  func.func @transform_1(%arg0: i32) -> (i32, i32) {
    %c0_i32 = arith.constant 0 : i32
    %c0_i32_0 = arith.constant 0 : i32
    %c0_i32_1 = arith.constant 0 : i32
    return %c0_i32, %c0_i32_0 : i32, i32
  }
  func.func @transform_2(%arg0: i32) -> (i32, i32) {
    %c0_i32 = arith.constant 0 : i32
    %c0_i32_0 = arith.constant 0 : i32
    %c0_i32_1 = arith.constant 0 : i32
    return %c0_i32, %c0_i32_0 : i32, i32
  }
  func.func @transform_3(%arg0: i32) -> (i32, i32) {
    %c0_i32 = arith.constant 0 : i32
    %c0_i32_0 = arith.constant 0 : i32
    return %arg0, %c0_i32 : i32, i32
  }
}

</mosaic_0001>

<bundles_post_ra>
// kernel: forward.3
= control target key start
LH: loop header
LB: loop body
LE: loop exit
PB: predicated region body
PF: predicated region fallthrough
CT: control target
= control target key end

     0   :  { %s886_s12 = smov 0   ;;  %s1123_s0 = inlined_call_operand.vmem [shape: bf16[2,9,9,16], index: 0, kind: input, shape index: {}]   ;;  %s1124_s1 = inlined_call_operand.vmem [shape: bf16[36,16], index: 1, kind: input, shape index: {}]   ;;  %s1125_s2 = inlined_call_operand.vmem [shape: f32[1,16], index: 2, kind: input, shape index: {}]   ;;  %s1126_s3 = inlined_call_operand.vmem [shape: bf16[128,16], index: 3, kind: output, shape index: {}]  }
   0x1 LB: > { %s892_s13 = sadd.s32 4294967295, %s859_s12   ;;  %p737_p0 = scmp.ge.s32.totalorder %s859_s12, 1  ;;  %s859_s12 = sphi %s886_s12, %s13_s12  }
   0x2   : > { %p137_p1 = scmp.lt.s32.totalorder %s859_s12, 3 }
   0x4   : > { %p138_p2 = pnand %p737_p0, %p137_p1 }
   0x5   : > { %p161_p3 = scmp.lt.s32.totalorder (!%p138_p2), %s892_s13, 1  ;;  %s861_s19 = smov (!%p138_p2), 4  }
   0x6   : > { %141 = sbr.rel (%p138_p2) target bundleno = 423 (0x1a7), region = 32  ;;  %s862_s20 = smov (!%p138_p2), 8  }
   0x7   : > { %s863_s21 = smov (!%p138_p2), 12   ;;  %s864_s22 = smov (!%p138_p2), 24  }
   0x8   : > { %s865_s29 = smov (!%p138_p2), 32   ;;  %s739_s30 = sshll.u32 (!%p138_p2), %s892_s13, 3 }
   0x9   : > { %p167_p4 = scmp.lt.s32.totalorder (!%p138_p2), %s739_s30, 15 }
   0xb   : > { %s162_s14 = scalar_select %p161_p3, %s892_s13, 1  ;;  %vm559_vm0 = vcmask 1041408   ;;  %vm396_vm1 = vcmask 64512   ;;  %vm413_vm2 = vcmask 97280   ;;  %vm430_vm3 = vcmask 130048  }
   0xc   : > { %vm439_vm4 = vcmask 162816   ;;  %vm456_vm5 = vcmask 195584   ;;  %vm473_vm6 = vcmask 228352   ;;  %vm482_vm7 = vcmask 261120   ;;  %s1128_s30 = smov (!%p167_p4, %s739_s30), 15 }
   0xd   : > { %s818_s15 = smul.u32 72, %s162_s14  ;;  %vm546_vm8 = vcmask 293888   ;;  %s740_s6 = sshll.u32 %s1128_s30, 2  ;;  %vm668_vm9 = vcmask 125952  }
   0xe   : > { %s1102_s9 = scalar_lea.vmem %s1126_s3, %s740_s6 }
   0xf   : > { %s901_s18 = scalar_lea.vmem %s1123_s0, %s818_s15 }
  0x10   : > { %v904_v0 = vld [vmem:[%s901_s18 + $0x8] sm:$0xf]  ;;  %v176_v1 = vld [vmem:[%s901_s18 + $0xc] sm:$0x1]  ;;  %v908_v2 = vld [vmem:[%s901_s18] sm:$0xf] }
  0x11   : > { %v912_v3 = vcombine.low %v904_v0, %v904_v0  ;;  %v742_v4 = vcombine.low %v904_v0, %v176_v1  ;;  %v174_v5 = vld [vmem:[%s901_s18 + $0x4] sm:$0x1]  ;;  %v749_v6 = vcombine.low %v908_v2, %v908_v2  ;;  %v919_v7 = vld [vmem:[%s901_s18 + $0x20] sm:$0xf]  ;;  %v925_v11 = vld [vmem:[%s901_s18 + $0x28] sm:$0xf] }
  0x12   : > { %v182_v8 = vld [vmem:[%s901_s18 + $0x24] sm:$0x1]  ;;  %v741_v9 = vcombine.low %v908_v2, %v174_v5  ;;  %v184_v12 = vld [vmem:[%s901_s18 + $0x2c] sm:$0x1]  ;;  %v929_v13 = vld [vmem:[%s901_s18 + $0x18] sm:$0xf]  ;;  %v754_v58 = vcombine.low %v925_v11, %v925_v11  ;;  %v753_v59 = vcombine.low %v919_v7, %v919_v7 }
  0x13   : > { %v745_v10 = vcombine.low %v919_v7, %v182_v8  ;;  %313 = vrot.lane.b32.xlu1 %v912_v3, %s861_s19  ;;  %311 = vrot.lane.b32.xlu0 %v749_v6, %s861_s19  ;;  %v746_v14 = vcombine.low %v925_v11, %v184_v12  ;;  %v239_v15 = vshrl.u32 %v742_v4, 16  ;;  %v241_v16 = vshll.u32 %v742_v4, 16  ;;  %v180_v17 = vld [vmem:[%s901_s18 + $0x1c] sm:$0x1]  ;;  %v937_v18 = vld [vmem:[%s901_s18 + $0x10] sm:$0xf] }
  0x14   : > { %v232_v21 = vshrl.u32 %v741_v9, 16  ;;  %v234_v22 = vshll.u32 %v741_v9, 16  ;;  %v178_v23 = vld [vmem:[%s901_s18 + $0x14] sm:$0x1]  ;;  %v744_v27 = vcombine.low %v929_v13, %v180_v17  ;;  %v942_v28 = vld [vmem:[%s901_s18 + $0x38] sm:$0xf]  ;;  %v752_v60 = vcombine.low %v929_v13, %v929_v13 }
  0x15   : > { %v260_v19 = vshrl.u32 %v745_v10, 16  ;;  %v262_v20 = vshll.u32 %v745_v10, 16  ;;  %v267_v24 = vshrl.u32 %v746_v14, 16  ;;  %v269_v25 = vshll.u32 %v746_v14, 16  ;;  %v188_v32 = vld [vmem:[%s901_s18 + $0x3c] sm:$0x1] }
  0x16   : > { %v243_v26 = vrot.slane %v241_v16, 1  ;;  %v236_v30 = vrot.slane %v234_v22, 1  ;;  %v743_v31 = vcombine.low %v937_v18, %v178_v23  ;;  %v947_v33 = vld [vmem:[%s901_s18 + $0x30] sm:$0xf]  ;;  %v255_v35 = vshll.u32 %v744_v27, 16  ;;  %v851_v5 = vld [vmem:[%s1124_s1 + $0x8] sm:$0xff]  }
  0x17   : > { %v264_v29 = vrot.slane %v262_v20, 1  ;;  %v271_v34 = vrot.slane %v269_v25, 1  ;;  %v186_v36 = vld [vmem:[%s901_s18 + $0x34] sm:$0x1]  ;;  %v253_v40 = vshrl.u32 %v744_v27, 16  ;;  %v748_v42 = vcombine.low %v942_v28, %v188_v32 }
  0x18   : > { %v237_v38 = vor.u32 %v236_v30, %v232_v21  ;;  %v248_v39 = vshll.u32 %v743_v31, 16  ;;  %v257_v41 = vrot.slane %v255_v35, 1  ;;  %v747_v43 = vcombine.low %v947_v33, %v186_v36  ;;  %v850_v1 = vld [vmem:[%s1124_s1 + $0x10] ss:$0 sps:$4 sm:$0x33]  }
  0x19   : > { %v950_v37 = vor.u32 %v264_v29, %v260_v19  ;;  %v955_v44 = vor.u32 %v271_v34, %v267_v24  ;;  %v957_v45 = vor.u32 %v243_v26, %v239_v15  ;;  %v246_v46 = vshrl.u32 %v743_v31, 16  ;;  %816 = vmatprep.subr.msk.bf16.mxu0 %vm559_vm0, %v850_v1  ;;  %817 = vmatprep.subr.msk.bf16.mxu1 %vm559_vm0, %v850_v1  ;;  %v189_v6 = vld [vmem:[%s901_s18 + $0x40] sm:$0xf]  ;;  %v190_v9 = vld [vmem:[%s901_s18 + $0x44] sm:$0x1] }
  0x1a   : > { %287 = vrot.lane.b32.xlu0 %v237_v38, %s862_s20  ;;  %v250_v47 = vrot.slane %v248_v39, 1  ;;  %v283_v48 = vshll.u32 %v748_v42, 16  ;;  %v276_v49 = vshll.u32 %v747_v43, 16  ;;  %v959_v50 = vor.u32 %v257_v41, %v253_v40 }
  0x1b   : > { %295 = vrot.lane.b32.xlu1 %v950_v37, %s862_s20  ;;  %v281_v51 = vshrl.u32 %v748_v42, 16  ;;  %v274_v54 = vshrl.u32 %v747_v43, 16  ;;  %v751_v61 = vcombine.low %v937_v18, %v937_v18  ;;  %v756_v62 = vcombine.low %v942_v28, %v942_v28 }
  0x1c   : > { %v251_v52 = vor.u32 %v250_v47, %v246_v46  ;;  %v285_v53 = vrot.slane %v283_v48, 1  ;;  %v278_v55 = vrot.slane %v276_v49, 1  ;;  %v755_v63 = vcombine.low %v947_v33, %v947_v33 }
  0x1d   : > { %v561_v4 = vsel %vm559_vm0, %v850_v1, 0  ;;  %v757_v8 = vcombine.low %v189_v6, %v189_v6  ;;  %v758_v10 = vcombine.low %v189_v6, %v190_v9 }
  0x1e   : > { %289 = vrot.lane.b32.xlu0 %v957_v45, %s862_s20  ;;  %v964_v56 = vor.u32 %v285_v53, %v281_v51  ;;  %v279_v57 = vor.u32 %v278_v55, %v274_v54  ;;  %797 = vmatpush3.bf16.msra.mxu0 %v561_v4 }
  0x1f   : > { %297 = vrot.lane.b32.xlu1 %v955_v44, %s862_s20  ;;  %813 = vmatpush3.bf16.msra.mxu1 %v561_v4  ;;  %v368_v12 = vshll.u32 %v758_v10, 16  ;;  %v366_v14 = vshrl.u32 %v758_v10, 16 }
  0x20   : > { %798 = vmatprep.subr.bf16.mxu0 %v851_v5  ;;  %811 = vmatprep.subr.bf16.mxu1 %v851_v5 }
  0x21   : > { %v370_v15 = vrot.slane %v368_v12, 1 }
  0x22   : > { %291 = vrot.lane.b32.xlu0 %v251_v52, %s862_s20  ;;  %799 = vmatpush3.bf16.msra.mxu0 %v851_v5 }
  0x23   : > { %293 = vrot.lane.b32.xlu1 %v959_v50, %s862_s20  ;;  %814 = vmatpush3.bf16.msra.mxu1 %v851_v5  ;;  %v371_v16 = vor.u32 %v370_v15, %v366_v14 }
  0x26   : > { %299 = vrot.lane.b32.xlu0 %v279_v57, %s862_s20 }
  0x27   : > { %301 = vrot.lane.b32.xlu1 %v964_v56, %s862_s20 }
  0x2a   : > { %319 = vrot.lane.b32.xlu0 %v753_v59, %s861_s19 }
  0x2b   : > { %321 = vrot.lane.b32.xlu1 %v754_v58, %s861_s19 }
  0x2e   : > { %315 = vrot.lane.b32.xlu0 %v751_v61, %s861_s19 }
  0x2f   : > { %317 = vrot.lane.b32.xlu1 %v752_v60, %s861_s19 }
  0x32   : > { %323 = vrot.lane.b32.xlu0 %v755_v63, %s861_s19 }
  0x33   : > { %325 = vrot.lane.b32.xlu1 %v756_v62, %s861_s19 }
  0x36   : > { %327 = vrot.lane.b32.xlu0 %v237_v38, %s863_s21 }
  0x37   : > { %329 = vrot.lane.b32.xlu1 %v957_v45, %s863_s21 }
  0x3a   : > { %335 = vrot.lane.b32.xlu0 %v950_v37, %s863_s21 }
  0x3b   : > { %337 = vrot.lane.b32.xlu1 %v955_v44, %s863_s21 }
  0x3e   : > { %331 = vrot.lane.b32.xlu0 %v251_v52, %s863_s21 }
  0x3f   : > { %333 = vrot.lane.b32.xlu1 %v959_v50, %s863_s21 }
  0x42   : > { %339 = vrot.lane.b32.xlu0 %v279_v57, %s863_s21 }
  0x43   : > { %341 = vrot.lane.b32.xlu1 %v964_v56, %s863_s21 }
  0x46   : > { %346 = vrot.lane.b32.xlu0 %v912_v3, %s864_s22  ;;  %v852_v3 = vld [vmem:[%s1124_s1] sm:$0xff]  }
  0x47   : > { %348 = vrot.lane.b32.xlu1 %v751_v61, %s864_s22  ;;  %800 = vmatprep.subr.bf16.mxu0 %v852_v3 }
  0x48   : > { %812 = vmatprep.subr.bf16.mxu1 %v852_v3  ;;  %801 = vmatpush3.bf16.msra.mxu0 %v852_v3 }
  0x49   : > { %815 = vmatpush3.bf16.msra.mxu1 %v852_v3 }
  0x4a   : > { %354 = vrot.lane.b32.xlu0 %v754_v58, %s864_s22 }
  0x4b   : > { %356 = vrot.lane.b32.xlu1 %v755_v63, %s864_s22 }
  0x4e   : > { %350 = vrot.lane.b32.xlu0 %v752_v60, %s864_s22 }
  0x4f   : > { %352 = vrot.lane.b32.xlu1 %v753_v59, %s864_s22 }
  0x52   : > { %358 = vrot.lane.b32.xlu0 %v756_v62, %s864_s22 }
  0x53   : > { %360 = vrot.lane.b32.xlu1 %v757_v8, %s864_s22 }
  0x56   : > { %372 = vrot.lane.b32.xlu0 %v957_v45, %s865_s29 }
  0x57   : > { %374 = vrot.lane.b32.xlu1 %v251_v52, %s865_s29 }
  0x5a   : > { %380 = vrot.lane.b32.xlu0 %v955_v44, %s865_s29 }
  0x5b   : > { %382 = vrot.lane.b32.xlu1 %v279_v57, %s865_s29 }
  0x5e   : > { %376 = vrot.lane.b32.xlu0 %v959_v50, %s865_s29 }
  0x5f   : > { %378 = vrot.lane.b32.xlu1 %v950_v37, %s865_s29 }
  0x62   : > { %384 = vrot.lane.b32.xlu0 %v964_v56, %s865_s29 }
  0x63   : > { %386 = vrot.lane.b32.xlu1 %v371_v16, %s865_s29 }
  0x85   : > { %v314_v17 = vpop.permute.xlu1 %313  ;;  %v312_v19 = vpop.permute.xlu0 %311 }
  0x8c   : > { %v288_v21 = vpop.permute.xlu0 %287 }
  0x8d   : > { %v296_v20 = vpop.permute.xlu1 %295  ;;  %v398_v48 = vsel %vm396_vm1, %v908_v2, %v288_v21 }
  0x8e   : > { %v415_v50 = vsel %vm413_vm2, %v398_v48, %v312_v19  ;;  %v406_v54 = vsel %vm396_vm1, %v919_v7, %v296_v20 }
  0x8f   : > { %v431_v56 = vsel %vm430_vm3, %v415_v50, %v312_v19 }
  0x90   : > { %v290_v23 = vpop.permute.xlu0 %289 }
  0x91   : > { %v298_v22 = vpop.permute.xlu1 %297  ;;  %v400_v49 = vsel %vm396_vm1, %v904_v0, %v290_v23 }
  0x92   : > { %v417_v51 = vsel %vm413_vm2, %v400_v49, %v314_v17  ;;  %v408_v55 = vsel %vm396_vm1, %v925_v11, %v298_v22 }
  0x93   : > { %v432_v2 = vsel %vm430_vm3, %v417_v51, %v314_v17 }
  0x94   : > { %v292_v25 = vpop.permute.xlu0 %291 }
  0x95   : > { %v294_v24 = vpop.permute.xlu1 %293  ;;  %v402_v63 = vsel %vm396_vm1, %v937_v18, %v292_v25 }
  0x96   : > { %v404_v11 = vsel %vm396_vm1, %v929_v13, %v294_v24 }
  0x98   : > { %v1009_v27 = vpop.permute.xlu0 %299 }
  0x99   : > { %v1007_v26 = vpop.permute.xlu1 %301  ;;  %v410_v19 = vsel %vm396_vm1, %v947_v33, %v1009_v27 }
  0x9a   : > { %v412_v17 = vsel %vm396_vm1, %v942_v28, %v1007_v26 }
  0x9c   : > { %v320_v30 = vpop.permute.xlu0 %319 }
  0x9d   : > { %v322_v29 = vpop.permute.xlu1 %321  ;;  %v423_v57 = vsel %vm413_vm2, %v406_v54, %v320_v30 }
  0x9e   : > { %v425_v0 = vsel %vm413_vm2, %v408_v55, %v322_v29  ;;  %v435_v4 = vsel %vm430_vm3, %v423_v57, %v320_v30 }
  0x9f   : > { %v436_v1 = vsel %vm430_vm3, %v425_v0, %v322_v29 }
  0xa0   : > { %v316_v32 = vpop.permute.xlu0 %315 }
  0xa1   : > { %v318_v31 = vpop.permute.xlu1 %317  ;;  %v419_v6 = vsel %vm413_vm2, %v402_v63, %v316_v32 }
  0xa2   : > { %v421_v5 = vsel %vm413_vm2, %v404_v11, %v318_v31  ;;  %v433_v22 = vsel %vm430_vm3, %v419_v6, %v316_v32 }
  0xa3   : > { %v434_v21 = vsel %vm430_vm3, %v421_v5, %v318_v31 }
  0xa4   : > { %v1013_v35 = vpop.permute.xlu0 %323 }
  0xa5   : > { %v1011_v34 = vpop.permute.xlu1 %325  ;;  %v427_v24 = vsel %vm413_vm2, %v410_v19, %v1013_v35 }
  0xa6   : > { %v429_v23 = vsel %vm413_vm2, %v412_v17, %v1011_v34 }
  0xa8   : > { %v328_v37 = vpop.permute.xlu0 %327 }
  0xa9   : > { %v330_v36 = vpop.permute.xlu1 %329  ;;  %v441_v59 = vsel %vm439_vm4, %v431_v56, %v328_v37 }
  0xaa   : > { %v443_v58 = vsel %vm439_vm4, %v432_v2, %v330_v36  ;;  %v759_v2 = vld [vmem:[%s1125_s2] ss:$0 sm:$0xff] }
  0xac   : > { %v336_v39 = vpop.permute.xlu0 %335 }
  0xad   : > { %v338_v38 = vpop.permute.xlu1 %337  ;;  %v449_v8 = vsel %vm439_vm4, %v435_v4, %v336_v39  ;;  %v437_v39 = vsel %vm430_vm3, %v427_v24, %v1013_v35 }
  0xae   : > { %v451_v3 = vsel %vm439_vm4, %v436_v1, %v338_v38  ;;  %v438_v38 = vsel %vm430_vm3, %v429_v23, %v1011_v34 }
  0xb0   : > { %v332_v41 = vpop.permute.xlu0 %331 }
  0xb1   : > { %v334_v40 = vpop.permute.xlu1 %333  ;;  %v445_v29 = vsel %vm439_vm4, %v433_v22, %v332_v41 }
  0xb2   : > { %v447_v25 = vsel %vm439_vm4, %v434_v21, %v334_v40 }
  0xb4   : > { %v1017_v43 = vpop.permute.xlu0 %339 }
  0xb5   : > { %v1015_v42 = vpop.permute.xlu1 %341  ;;  %v453_v41 = vsel %vm439_vm4, %v437_v39, %v1017_v43 }
  0xb6   : > { %v455_v40 = vsel %vm439_vm4, %v438_v38, %v1015_v42 }
  0xb8   : > { %v347_v45 = vpop.permute.xlu0 %346 }
  0xb9   : > { %v349_v44 = vpop.permute.xlu1 %348  ;;  %v458_v62 = vsel %vm456_vm5, %v441_v59, %v347_v45 }
  0xba   : > { %v460_v7 = vsel %vm456_vm5, %v443_v58, %v349_v44  ;;  %v474_v13 = vsel %vm473_vm6, %v458_v62, %v347_v45 }
  0xbb   : > { %v475_v9 = vsel %vm473_vm6, %v460_v7, %v349_v44 }
  0xbc   : > { %v355_v47 = vpop.permute.xlu0 %354 }
  0xbd   : > { %v357_v46 = vpop.permute.xlu1 %356  ;;  %v466_v14 = vsel %vm456_vm5, %v449_v8, %v355_v47 }
  0xbe   : > { %v468_v12 = vsel %vm456_vm5, %v451_v3, %v357_v46  ;;  %v478_v26 = vsel %vm473_vm6, %v466_v14, %v355_v47 }
  0xbf   : > { %v479_v28 = vsel %vm473_vm6, %v468_v12, %v357_v46 }
  0xc0   : > { %v351_v53 = vpop.permute.xlu0 %350 }
  0xc1   : > { %v353_v52 = vpop.permute.xlu1 %352  ;;  %v462_v31 = vsel %vm456_vm5, %v445_v29, %v351_v53 }
  0xc2   : > { %v464_v30 = vsel %vm456_vm5, %v447_v25, %v353_v52  ;;  %v476_v45 = vsel %vm473_vm6, %v462_v31, %v351_v53 }
  0xc3   : > { %v477_v44 = vsel %vm473_vm6, %v464_v30, %v353_v52 }
  0xc4   : > { %v359_v61 = vpop.permute.xlu0 %358 }
  0xc5   : > { %v361_v60 = vpop.permute.xlu1 %360  ;;  %v470_v48 = vsel %vm456_vm5, %v453_v41, %v359_v61 }
  0xc6   : > { %v472_v34 = vsel %vm456_vm5, %v455_v40, %v361_v60  ;;  %v480_v50 = vsel %vm473_vm6, %v470_v48, %v359_v61 }
  0xc7   : > { %v481_v43 = vsel %vm473_vm6, %v472_v34, %v361_v60 }
  0xc8   : > { %v373_v18 = vpop.permute.xlu0 %372 }
  0xc9   : > { %v375_v10 = vpop.permute.xlu1 %374  ;;  %v484_v16 = vsel %vm482_vm7, %v474_v13, %v373_v18 }
  0xca   : > { %v486_v15 = vsel %vm482_vm7, %v475_v9, %v375_v10 }
  0xcb   : > { %v760_v20 = vcombine.low %v484_v16, %v486_v15 }
  0xcc   : > { %v381_v27 = vpop.permute.xlu0 %380 }
  0xcd   : > { %v383_v33 = vpop.permute.xlu1 %382  ;;  %802 = vmatprep.mubr.msk.bf16.mxu0 %vm546_vm8, %v760_v20  ;;  %v492_v36 = vsel %vm482_vm7, %v478_v26, %v381_v27 }
  0xce   : > { %v494_v32 = vsel %vm482_vm7, %v479_v28, %v383_v33 }
  0xcf   : > { %v762_v37 = vcombine.low %v492_v36, %v494_v32 }
  0xd0   : > { %v377_v47 = vpop.permute.xlu0 %376 }
  0xd1   : > { %v379_v46 = vpop.permute.xlu1 %378  ;;  %806 = vmatprep.mubr.msk.bf16.mxu1 %vm546_vm8, %v762_v37  ;;  %v488_v42 = vsel %vm482_vm7, %v476_v45, %v377_v47 }
  0xd2   : > { %v490_v35 = vsel %vm482_vm7, %v477_v44, %v379_v46 }
  0xd3   : > { %v761_v49 = vcombine.low %v488_v42, %v490_v35 }
  0xd4   : > { %v385_v52 = vpop.permute.xlu0 %384 }
  0xd5   : > { %v387_v51 = vpop.permute.xlu1 %386  ;;  %803 = vmatmul.mubr.msk.bf16.vlgmr.msra.gmra.mxu0 %vm546_vm8, %v761_v49  ;;  %v496_v54 = vsel %vm482_vm7, %v480_v50, %v385_v52 }
  0xd6   : > { %v498_v53 = vsel %vm482_vm7, %v481_v43, %v387_v51 }
  0xd7   : > { %v763_v55 = vcombine.low %v496_v54, %v498_v53 }
  0xd9   : > { %807 = vmatmul.mubr.msk.bf16.vlgmr.msra.gmra.mxu1 %vm546_vm8, %v763_v55 }
 0x195   : > { %v804_v56 = vpop.f32.mrf.mxu0 }
 0x196   : > { %v606_v0 = vadd.f32 %v804_v56, %v759_v2 }
 0x197   : > { %v597_v57 = vpop.f32.mrf.mxu0 }
 0x198   : > { %v630_v58 = vmax.f32 %v606_v0, 0.0  ;;  %v598_v59 = vadd.f32 %v759_v2, %v597_v57 }
 0x199   : > { %v805_v60 = vpop.f32.mrf.mxu0  ;;  %v808_v61 = vpop.f32.mrf.mxu1 }
 0x19a   : > { %v783_v7 = vpack.c.bf16 %v630_v58, %v630_v58  ;;  %v628_v62 = vmax.f32 %v598_v59, 0.0  ;;  %v609_v11 = vadd.f32 %v805_v60, %v759_v2  ;;  %v622_v63 = vadd.f32 %v808_v61, %v759_v2 }
 0x19b   : > { %v600_v1 = vpop.f32.mrf.mxu0  ;;  %v613_v4 = vpop.f32.mrf.mxu1 }
 0x19c   : > { %671 = vst.msk [vmem:[%s1102_s9 + $0x8] sm:$0xf] %vm668_vm9, %v783_v7  ;;  %v781_v5 = vpack.c.bf16 %v628_v62, %v628_v62  ;;  %v631_v6 = vmax.f32 %v609_v11, 0.0  ;;  %v634_v3 = vmax.f32 %v622_v63, 0.0  ;;  %v601_v8 = vadd.f32 %v759_v2, %v600_v1 }
 0x19d   : > { %v614_v9 = vadd.f32 %v759_v2, %v613_v4  ;;  %v809_v13 = vpop.f32.mrf.mxu1 }
 0x19e   : > { %669 = vst.msk [vmem:[%s1102_s9] sm:$0xf] %vm668_vm9, %v781_v5  ;;  %v784_v10 = vpack.c.bf16 %v631_v6, %v631_v6  ;;  %v787_v18 = vpack.c.bf16 %v634_v3, %v634_v3  ;;  %v629_v12 = vmax.f32 %v601_v8, 0.0  ;;  %v625_v14 = vadd.f32 %v809_v13, %v759_v2 }
 0x19f   : > { %v632_v15 = vmax.f32 %v614_v9, 0.0  ;;  %v616_v16 = vpop.f32.mrf.mxu1 }
 0x1a0   : > { %672 = vst.msk [vmem:[%s1102_s9 + $0xc] sm:$0xf] %vm668_vm9, %v784_v10  ;;  %675 = vst.msk [vmem:[%s1102_s9 + $0x18] sm:$0xf] %vm668_vm9, %v787_v18  ;;  %v782_v17 = vpack.c.bf16 %v629_v12, %v629_v12  ;;  %v635_v19 = vmax.f32 %v625_v14, 0.0  ;;  %v617_v20 = vadd.f32 %v759_v2, %v616_v16 }
 0x1a1   : > { %v785_v21 = vpack.c.bf16 %v632_v15, %v632_v15 }
 0x1a2   : > { %670 = vst.msk [vmem:[%s1102_s9 + $0x4] sm:$0xf] %vm668_vm9, %v782_v17  ;;  %v788_v22 = vpack.c.bf16 %v635_v19, %v635_v19  ;;  %v633_v23 = vmax.f32 %v617_v20, 0.0 }
 0x1a3   : > { %673 = vst.msk [vmem:[%s1102_s9 + $0x10] sm:$0xf] %vm668_vm9, %v785_v21 }
 0x1a4   : > { %676 = vst.msk [vmem:[%s1102_s9 + $0x1c] sm:$0xf] %vm668_vm9, %v788_v22  ;;  %v786_v24 = vpack.c.bf16 %v633_v23, %v633_v23 }
 0x1a6   : > { %674 = vst.msk [vmem:[%s1102_s9 + $0x14] sm:$0xf] %vm668_vm9, %v786_v24 }
 0x1a7 PF: > { %s13_s12 = sadd.s32 1, %s859_s12  }
 0x1a8   : > { %p10_p5 = scmp.ge.s32.totalorder %s13_s12, 4  }
 0x1aa   :  { %12 = sbr.rel (!%p10_p5) target bundleno = 1 (0x1), region = 62 }

// kernel: forward.4
= control target key start
LH: loop header
LB: loop body
LE: loop exit
PB: predicated region body
PF: predicated region fallthrough
CT: control target
= control target key end

     0   :  { %s651_s12 = smov 0   ;;  %s778_s0 = inlined_call_operand.vmem [shape: bf16[2,5,5,64], index: 0, kind: input, shape index: {}]   ;;  %s779_s1 = inlined_call_operand.vmem [shape: bf16[144,32], index: 1, kind: input, shape index: {}]   ;;  %s780_s2 = inlined_call_operand.vmem [shape: f32[1,32], index: 2, kind: input, shape index: {}]   ;;  %s781_s3 = inlined_call_operand.vmem [shape: bf16[32,32], index: 3, kind: output, shape index: {}]  }
   0x1 LB: > { %s657_s13 = sadd.s32 4294967295, %s623_s12   ;;  %p562_p0 = scmp.ge.s32.totalorder %s623_s12, 1  ;;  %s623_s12 = sphi %s651_s12, %s13_s12  }
   0x2   : > { %p137_p1 = scmp.lt.s32.totalorder %s623_s12, 3 }
   0x4   : > { %p138_p2 = pnand %p562_p0, %p137_p1 }
   0x5   : > { %p161_p3 = scmp.lt.s32.totalorder (!%p138_p2), %s657_s13, 1  ;;  %s626_s25 = smov (!%p138_p2), 16  }
   0x6   : > { %141 = sbr.rel (%p138_p2) target bundleno = 379 (0x17b), region = 32  ;;  %s627_s30 = smov (!%p138_p2), 32  }
   0x7   : > { %s628_s8 = smov (!%p138_p2), 48   ;;  %s629_s15 = smov (!%p138_p2), 96  }
   0xb   : > { %v608_v0 = vld [vmem:[%s779_s1 + $0x38] sm:$0xff]   ;;  %v625_v1 = vmov 0   ;;  %s162_s16 = scalar_select %p161_p3, %s657_s13, 1  ;;  %v609_v2 = vld [vmem:[%s779_s1 + $0x30] sm:$0xff]   ;;  %v610_v11 = vld [vmem:[%s779_s1 + $0x28] sm:$0xff]   ;;  %vm265_vm0 = vcmask 261120   ;;  %v319_v46 = vlaneseq }
   0xc   : > { %448 = vmatprep.subr.bf16.mxu0 %v625_v1  ;;  %v611_v21 = vld [vmem:[%s779_s1 + $0x20] sm:$0xff]   ;;  %v612_v27 = vld [vmem:[%s779_s1 + $0x18] sm:$0xff]   ;;  %v613_v30 = vld [vmem:[%s779_s1 + $0x10] sm:$0xff]   ;;  %vm274_vm1 = vcmask 392192   ;;  %v630_v48 = vmov 1983009808  }
   0xd   : > { %449 = vmatpush1.bf16.msra.mxu0 %v608_v0  ;;  %s588_s17 = smul.u32 20, %s162_s16  ;;  %v614_v31 = vld [vmem:[%s779_s1 + $0x8] sm:$0xff]   ;;  %v615_v32 = vld [vmem:[%s779_s1] sm:$0xff]   ;;  %v317_v49 = vunpack.c.l.s4 %v630_v48  ;;  %vm283_vm2 = vcmask 523264   ;;  %vm288_vm3 = vcmask 654336   ;;  %v320_v55 = vshrl.u32 %v319_v46, 7 }
   0xe   : > { %450 = vmatprep.subr.bf16.mxu0 %v625_v1  ;;  %v616_v33 = vld [vmem:[%s779_s1 + $0x40] sm:$0xff]   ;;  %vm297_vm4 = vcmask 785408   ;;  %vm306_vm5 = vcmask 916480   ;;  %vm260_vm6 = vcmask 130048   ;;  %s564_s16 = sshll.u32 %s657_s13, 1  ;;  %vm499_vm7 = vcmask 257024  }
   0xf   : > { %s674_s22 = scalar_lea.vmem %s778_s0, %s588_s17  ;;  %v318_v59 = vunpack.c.0.s8 %v317_v49  ;;  %p167_p4 = scmp.lt.s32.totalorder %s564_s16, 3 }
  0x10   : > { %v677_v3 = vld [vmem:[%s674_s22 + $0x4] sm:$0x7]  ;;  %v680_v4 = vld [vmem:[%s674_s22] sm:$0x7]  ;;  %v683_v5 = vld [vmem:[%s674_s22 + $0xc] sm:$0x7] }
  0x11   : > { %451 = vmatpush1.bf16.msra.mxu0 %v609_v2  ;;  %v567_v6 = vcombine.low %v677_v3, %v677_v3  ;;  %v566_v7 = vcombine.low %v680_v4, %v680_v4  ;;  %v569_v8 = vcombine.low %v683_v5, %v683_v5  ;;  %v692_v9 = vld [vmem:[%s674_s22 + $0x8] sm:$0x7]  ;;  %v607_v34 = vld [vmem:[%s674_s22 + $0x10] ss:$0 sps:$4 sm:$0x77]   ;;  %s783_s16 = smov (!%p167_p4, %s564_s16), 3 }
  0x12   : > { %452 = vmatprep.subr.bf16.mxu0 %v625_v1  ;;  %v568_v10 = vcombine.low %v692_v9, %v692_v9  ;;  %v256_v51 = vshll.u32 %v607_v34, 16  ;;  %v254_v60 = vshrl.u32 %v607_v34, 16  ;;  %s565_s19 = sshll.u32 %s783_s16, 2 }
  0x13   : > { %228 = vrot.lane.b32.xlu1 %v567_v6, %s626_s25  ;;  %226 = vrot.lane.b32.xlu0 %v566_v7, %s626_s25  ;;  %v191_v12 = vshrl.u32 %v566_v7, 16  ;;  %v193_v13 = vshll.u32 %v566_v7, 16  ;;  %v214_v14 = vshll.u32 %v569_v8, 16  ;;  %v200_v17 = vshll.u32 %v567_v6, 16  ;;  %s170_s22 = scalar_lea.vmem %s781_s3, %s565_s19 }
  0x14   : > { %v205_v15 = vshrl.u32 %v568_v10, 16  ;;  %v207_v16 = vshll.u32 %v568_v10, 16  ;;  %v212_v20 = vshrl.u32 %v569_v8, 16  ;;  %v198_v24 = vshrl.u32 %v567_v6, 16 }
  0x15   : > { %453 = vmatpush1.bf16.msra.mxu0 %v610_v11  ;;  %v195_v18 = vrot.slane %v193_v13, 1  ;;  %v216_v23 = vrot.slane %v214_v14, 1  ;;  %v202_v25 = vrot.slane %v200_v17, 1  ;;  %v258_v61 = vrot.slane %v256_v51, 1 }
  0x16   : > { %454 = vmatprep.subr.bf16.mxu0 %v625_v1  ;;  %v209_v19 = vrot.slane %v207_v16, 1 }
  0x17   : > { %232 = vrot.lane.b32.xlu1 %v569_v8, %s626_s25  ;;  %230 = vrot.lane.b32.xlu0 %v568_v10, %s626_s25  ;;  %v196_v22 = vor.u32 %v195_v18, %v191_v12  ;;  %v711_v28 = vor.u32 %v216_v23, %v212_v20  ;;  %v713_v29 = vor.u32 %v202_v25, %v198_v24 }
  0x18   : > { %v704_v26 = vor.u32 %v209_v19, %v205_v15 }
  0x19   : > { %455 = vmatpush1.bf16.msra.mxu0 %v611_v21 }
  0x1a   : > { %456 = vmatprep.subr.bf16.mxu0 %v625_v1 }
  0x1b   : > { %222 = vrot.lane.b32.xlu1 %v704_v26, %s627_s30  ;;  %218 = vrot.lane.b32.xlu0 %v196_v22, %s627_s30 }
  0x1d   : > { %457 = vmatpush1.bf16.msra.mxu0 %v612_v27 }
  0x1e   : > { %458 = vmatprep.subr.bf16.mxu0 %v625_v1 }
  0x1f   : > { %224 = vrot.lane.b32.xlu1 %v711_v28, %s627_s30  ;;  %220 = vrot.lane.b32.xlu0 %v713_v29, %s627_s30 }
  0x21   : > { %459 = vmatpush1.bf16.msra.mxu0 %v613_v30 }
  0x22   : > { %460 = vmatprep.subr.bf16.mxu0 %v625_v1 }
  0x23   : > { %236 = vrot.lane.b32.xlu1 %v713_v29, %s628_s8  ;;  %234 = vrot.lane.b32.xlu0 %v196_v22, %s628_s8 }
  0x25   : > { %461 = vmatpush1.bf16.msra.mxu0 %v614_v31 }
  0x26   : > { %462 = vmatprep.subr.bf16.mxu0 %v625_v1 }
  0x27   : > { %240 = vrot.lane.b32.xlu1 %v711_v28, %s628_s8  ;;  %238 = vrot.lane.b32.xlu0 %v704_v26, %s628_s8 }
  0x29   : > { %463 = vmatpush1.bf16.msra.mxu0 %v615_v32 }
  0x2a   : > { %478 = vmatprep.subr.bf16.mxu0 %v625_v1 }
  0x2b   : > { %247 = vrot.lane.b32.xlu1 %v568_v10, %s629_s15  ;;  %245 = vrot.lane.b32.xlu0 %v567_v6, %s629_s15  ;;  %v259_v10 = vor.u32 %v258_v61, %v254_v60 }
  0x2d   : > { %479 = vmatpush2.bf16.msra.mxu0 %v616_v33 }
  0x2f   : > { %251 = vrot.lane.b32.xlu1 %v607_v34, %s629_s15  ;;  %249 = vrot.lane.b32.xlu0 %v569_v8, %s629_s15 }
  0x85   : > { %v229_v35 = vpop.permute.xlu1 %228  ;;  %v227_v36 = vpop.permute.xlu0 %226 }
  0x89   : > { %v233_v37 = vpop.permute.xlu1 %232  ;;  %v231_v38 = vpop.permute.xlu0 %230 }
  0x8d   : > { %v223_v39 = vpop.permute.xlu1 %222  ;;  %v219_v40 = vpop.permute.xlu0 %218 }
  0x8e   : > { %v267_v47 = vsel %vm265_vm0, %v680_v4, %v219_v40  ;;  %v271_v56 = vsel %vm265_vm0, %v692_v9, %v223_v39 }
  0x8f   : > { %v276_v52 = vsel %vm274_vm1, %v267_v47, %v227_v36  ;;  %v280_v63 = vsel %vm274_vm1, %v271_v56, %v231_v38 }
  0x90   : > { %v284_v62 = vsel %vm283_vm2, %v276_v52, %v227_v36  ;;  %v286_v12 = vsel %vm283_vm2, %v280_v63, %v231_v38  ;;  %v571_v36 = vld [vmem:[%s780_s2] ss:$0 sm:$0xff] }
  0x91   : > { %v225_v41 = vpop.permute.xlu1 %224  ;;  %v221_v42 = vpop.permute.xlu0 %220 }
  0x92   : > { %v269_v43 = vsel %vm265_vm0, %v677_v3, %v221_v42  ;;  %v273_v57 = vsel %vm265_vm0, %v683_v5, %v225_v41  ;;  %v321_v5 = vsub.s32 %v318_v59, %v320_v55 }
  0x93   : > { %v278_v50 = vsel %vm274_vm1, %v269_v43, %v229_v35  ;;  %v282_v0 = vsel %vm274_vm1, %v273_v57, %v233_v37 }
  0x94   : > { %v285_v58 = vsel %vm283_vm2, %v278_v50, %v229_v35  ;;  %v287_v11 = vsel %vm283_vm2, %v282_v0, %v233_v37 }
  0x95   : > { %v237_v44 = vpop.permute.xlu1 %236  ;;  %v235_v45 = vpop.permute.xlu0 %234 }
  0x96   : > { %v292_v1 = vsel %vm288_vm3, %v285_v58, %v237_v44  ;;  %v290_v2 = vsel %vm288_vm3, %v284_v62, %v235_v45 }
  0x99   : > { %v241_v53 = vpop.permute.xlu1 %240  ;;  %v239_v54 = vpop.permute.xlu0 %238 }
  0x9a   : > { %v296_v15 = vsel %vm288_vm3, %v287_v11, %v241_v53  ;;  %v294_v16 = vsel %vm288_vm3, %v286_v12, %v239_v54 }
  0x9d   : > { %v248_v3 = vpop.permute.xlu1 %247  ;;  %v246_v4 = vpop.permute.xlu0 %245 }
  0x9e   : > { %v301_v6 = vsel %vm297_vm4, %v292_v1, %v248_v3  ;;  %v299_v7 = vsel %vm297_vm4, %v290_v2, %v246_v4 }
  0x9f   : > { %v308_v8 = vsel %vm306_vm5, %v301_v6, %v248_v3  ;;  %v307_v9 = vsel %vm306_vm5, %v299_v7, %v246_v4 }
  0xa0   : > { %v323_v13 = vcombine.low %v308_v8, %v704_v26  ;;  %v315_v14 = vcombine.low %v307_v9, %v713_v29 }
  0xa1   : > { %v252_v17 = vpop.permute.xlu1 %251  ;;  %v250_v18 = vpop.permute.xlu0 %249 }
  0xa2   : > { %v330_v19 = vrot.slane %v323_v13, %v321_v5  ;;  %v322_v20 = vrot.slane %v315_v14, %v321_v5  ;;  %v305_v21 = vsel %vm297_vm4, %v296_v15, %v252_v17  ;;  %v303_v22 = vsel %vm297_vm4, %v294_v16, %v250_v18 }
  0xa3   : > { %v310_v23 = vsel %vm306_vm5, %v305_v21, %v252_v17  ;;  %v309_v24 = vsel %vm306_vm5, %v303_v22, %v250_v18 }
  0xa4   : > { %v339_v25 = vcombine.low %v310_v23, %v259_v10  ;;  %v331_v26 = vcombine.low %v309_v24, %v711_v28  ;;  %v372_v30 = vcombine.low %v322_v20, %v330_v19 }
  0xa6   : > { %v346_v27 = vrot.slane %v339_v25, %v321_v5  ;;  %v338_v29 = vrot.slane %v331_v26, %v321_v5  ;;  %v380_v32 = vrot.slane %v372_v30, %v321_v5 }
  0xa8   : > { %v373_v31 = vcombine.low %v338_v29, %v346_v27 }
  0xaa   : > { %v387_v33 = vrot.slane %v373_v31, %v321_v5 }
  0xac   : > { %v389_v34 = vcombine.high %v380_v32, %v387_v33  ;;  %v388_v35 = vcombine.low %v380_v32, %v387_v33 }
  0xae   : > { %581 = vmatprep.mubr.msk.bf16.mxu0 %vm260_vm6, %v389_v34 }
  0xaf   : > { %481 = vmatmul.mubr.bf16.vlgmr.msra.gmra.mxu0 %v388_v35 }
 0x16f   : > { %v482_v37 = vpop.f32.mrf.mxu0 }
 0x170   : > { %v483_v28 = vadd.f32 %v571_v36, %v482_v37 }
 0x171   : > { %v484_v38 = vpop.f32.mrf.mxu0 }
 0x172   : > { %v489_v39 = vmax.f32 %v483_v28, 0.0 }
 0x173   : > { %v485_v40 = vpop.f32.mrf.mxu0 }
 0x174   : > { %v586_v41 = vpack.c.bf16 %v489_v39, %v489_v39  ;;  %v486_v42 = vadd.f32 %v571_v36, %v485_v40 }
 0x175   : > { %v487_v43 = vpop.f32.mrf.mxu0 }
 0x176   : > { %500 = vst.msk [vmem:[%s170_s22] sm:$0xf] %vm499_vm7, %v586_v41  ;;  %v490_v44 = vmax.f32 %v486_v42, 0.0 }
 0x178   : > { %v587_v45 = vpack.c.bf16 %v490_v44, %v490_v44 }
 0x17a   : > { %501 = vst.msk [vmem:[%s170_s22 + $0x4] sm:$0xf] %vm499_vm7, %v587_v45 }
 0x17b PF: > { %s13_s12 = sadd.s32 1, %s623_s12  }
 0x17c   : > { %p10_p5 = scmp.ge.s32.totalorder %s13_s12, 4  }
 0x17e   :  { %12 = sbr.rel (!%p10_p5) target bundleno = 1 (0x1), region = 62 }

// kernel: forward.5
= control target key start
LH: loop header
LB: loop body
LE: loop exit
PB: predicated region body
PF: predicated region fallthrough
CT: control target
= control target key end

     0   :  { %s1110_s30 = smov 0   ;;  %s1208_s0 = inlined_call_operand.vmem [shape: bf16[128,16], index: 0, kind: input, shape index: {}]   ;;  %s1209_s1 = inlined_call_operand.vmem [shape: bf16[32,32], index: 1, kind: input, shape index: {}]   ;;  %s1210_s2 = inlined_call_operand.vmem [shape: bf16[16,32], index: 2, kind: input, shape index: {}]   ;;  %s1211_s3 = inlined_call_operand.vmem [shape: f32[1,32], index: 3, kind: input, shape index: {}]   ;;  %s1212_s4 = inlined_call_operand.vmem [shape: bf16[32,32], index: 4, kind: input, shape index: {}]   ;;  %s1213_s5 = inlined_call_operand.vmem [shape: f32[1,32], index: 5, kind: input, shape index: {}]   ;;  %s1214_s6 = inlined_call_operand.vmem [shape: bf16[8,32], index: 6, kind: input, shape index: {}]   ;;  %s1215_s7 = inlined_call_operand.vmem [shape: bf16[32,128], index: 7, kind: input, shape index: {}]   ;;  %s1216_s8 = inlined_call_operand.vmem [shape: f32[1,128], index: 8, kind: input, shape index: {}]   ;;  %s1217_s9 = inlined_call_operand.vmem [shape: f32[16,128], index: 9, kind: output, shape index: {}]  }
   0x1 LB: > { %s1116_s10 = sadd.s32 4294967295, %s1056_s30   ;;  %p906_p0 = scmp.ge.s32.totalorder %s1056_s30, 1  ;;  %s1056_s30 = sphi %s1110_s30, %s19_s30  }
   0x2   : > { %p299_p1 = scmp.lt.s32.totalorder %s1056_s30, 3 }
   0x4   : > { %p300_p2 = pnand %p906_p0, %p299_p1 }
   0x5   : > { %s907_s13 = sshll.u32 (!%p300_p2), %s1116_s10, 3  ;;  %s909_s18 = sshll.u32 (!%p300_p2), %s1116_s10, 1 }
   0x6   : > { %303 = sbr.rel (%p300_p2) target bundleno = 1032 (0x408), region = 56  ;;  %p340_p3 = scmp.lt.s32.totalorder (!%p300_p2), %s907_s13, 15 }
   0x7   : > { %p346_p4 = scmp.lt.s32.totalorder (!%p300_p2), %s909_s18, 3  ;;  %p351_p5 = scmp.lt.s32.totalorder (!%p300_p2), %s1116_s10, 1 }
   0xb   : > { %v1034_v0 = vld [vmem:[%s1210_s2] sm:$0xff]   ;;  %v1039_v1 = vld [vmem:[%s1212_s4 + $0x8] sm:$0xff]   ;;  %v1058_v2 = vmov 0.0   ;;  %s1219_s13 = smov (!%p340_p3, %s907_s13), 15  ;;  %vm1059_vm0 = vmmov 0   ;;  %vm399_vm1 = vcmask 130048  }
   0xc   : > { %962 = vmatprep.subr.bf16.mxu0 %v1034_v0  ;;  %972 = vmatprep.subr.bf16.mxu1 %v1058_v2  ;;  %v1040_v3 = vld [vmem:[%s1212_s4] sm:$0xff]   ;;  %s908_s19 = sshll.u32 %s1219_s13, 2  ;;  %s1221_s18 = smov (!%p346_p4, %s909_s18), 3  ;;  %vm507_vm2 = vcmask 261120   ;;  %vm658_vm3 = vcmask 523264  }
   0xd   : > { %963 = vmatpush3.bf16.msra.mxu0 %v1034_v0  ;;  %973 = vmatpush3.bf16.msra.mxu1 %v1039_v1  ;;  %s343_s22 = scalar_lea.vmem %s1208_s0, %s908_s19  ;;  %s910_s23 = sshll.u32 %s1221_s18, 2  ;;  %v922_v11 = vld [vmem:[%s1213_s5] ss:$0 sm:$0xff] }
   0xe   : > { %974 = vmatprep.subr.bf16.mxu1 %v1058_v2  ;;  %976 = vmatprep.mubr.msk.bf16.mxu1 %vm1059_vm0, %v1058_v2  ;;  %v1035_v4 = vld [vmem:[%s343_s22] sm:$0xff]   ;;  %v1036_v5 = vld [vmem:[%s343_s22 + $0x8] sm:$0xff]   ;;  %v1037_v6 = vld [vmem:[%s343_s22 + $0x10] sm:$0xff]   ;;  %s349_s26 = scalar_lea.vmem %s1209_s1, %s910_s23  ;;  %s1223_s10 = smov (!%p351_p5, %s1116_s10), 1 }
   0xf   : > { %980 = vmatprep.subr.bf16.mxu0 %v1058_v2  ;;  %964 = vmatprep.mubr.msk.bf16.mxu0 %vm399_vm1, %v1035_v4  ;;  %v1041_v7 = vld [vmem:[%s349_s26] sm:$0xff]   ;;  %v1038_v8 = vld [vmem:[%s343_s22 + $0x18] sm:$0xff]   ;;  %s911_s18 = sshll.u32 %s1223_s10, 3 }
  0x10   : > { %965 = vmatmul.mubr.msk.bf16.vlgmr.msra.gmra.mxu0 %vm399_vm1, %v1036_v5  ;;  %v912_v23 = vld [vmem:[%s1211_s3] ss:$0 sm:$0xff]  ;;  %s354_s23 = scalar_lea.vmem %s1217_s9, %s911_s18 }
  0x11   : > { %975 = vmatpush3.bf16.msra.mxu1 %v1040_v3  ;;  %968 = vmatprep.mubr.msk.bf16.mxu0 %vm399_vm1, %v1037_v6  ;;  %v557_v32 = vld [vmem:[%s1214_s6] sm:$0xf]  ;;  %v1042_v6 = vld [vmem:[%s1215_s7 + $0x8] sm:$0xff]  }
  0x12   : > { %992 = vmatprep.subr.bf16.mxu1 %v1058_v2 }
  0x14   : > { %977 = vmatmul.mubr.msk.bf16.vlgmr.msra.gmra.mxu1 %vm507_vm2, %v1041_v7  ;;  %v1043_v7 = vld [vmem:[%s1215_s7] sm:$0xff]  }
  0x15   : > { %994 = vmatprep.mubr.msk.bf16.mxu1 %vm1059_vm0, %v1058_v2 }
  0x18   : > { %969 = vmatmul.mubr.msk.bf16.gmra.mxu0 %vm399_vm1, %v1038_v8 }
  0x19   : > { %988 = vmatprep.mubr.msk.bf16.mxu0 %vm1059_vm0, %v1058_v2 }
  0xd0   : > { %v966_v9 = vpop.f32.mrf.mxu0 }
  0xd1   : > { %v455_v37 = vadd.f32 %v966_v9, %v912_v23 }
  0xd2   : > { %v446_v10 = vpop.f32.mrf.mxu0 }
  0xd3   : > { %v447_v41 = vadd.f32 %v912_v23, %v446_v10 }
  0xd4   : > { %v545_v12 = vpop.f32.mrf.mxu1  ;;  %v967_v13 = vpop.f32.mrf.mxu0 }
  0xd5   : > { %v546_v16 = vadd.f32 %v922_v11, %v545_v12  ;;  %v458_v35 = vadd.f32 %v967_v13, %v912_v23 }
  0xd6   : > { %v978_v14 = vpop.f32.mrf.mxu1  ;;  %v449_v15 = vpop.f32.mrf.mxu0 }
  0xd7   : > { %v553_v38 = vpack.c.bf16 %v458_v35, %v455_v37  ;;  %v450_v39 = vadd.f32 %v912_v23, %v449_v15 }
  0xd8   : > { %v548_v17 = vpop.f32.mrf.mxu1  ;;  %v970_v18 = vpop.f32.mrf.mxu0 }
  0xd9   : > { %v549_v19 = vadd.f32 %v922_v11, %v548_v17  ;;  %v471_v26 = vadd.f32 %v970_v18, %v912_v23  ;;  %v565_v40 = vsel %vm507_vm2, %v553_v38, 0  ;;  %v552_v42 = vpack.c.bf16 %v450_v39, %v447_v41 }
  0xda   : > { %v979_v20 = vpop.f32.mrf.mxu1  ;;  %v462_v21 = vpop.f32.mrf.mxu0 }
  0xdb   : > { %v556_v22 = vpack.c.bf16 %v549_v19, %v546_v16  ;;  %v463_v33 = vadd.f32 %v912_v23, %v462_v21  ;;  %v562_v43 = vsel %vm507_vm2, %v552_v42, 0 }
  0xdc   : > { %v971_v24 = vpop.f32.mrf.mxu0 }
  0xdd   : > { %v615_v25 = vsel %vm507_vm2, %v556_v22, 0  ;;  %v474_v27 = vadd.f32 %v971_v24, %v912_v23 }
  0xde   : > { %993 = vmatpush3.bf16.xpose.msra.mxu1 %v615_v25  ;;  %v465_v28 = vpop.f32.mrf.mxu0 }
  0xdf   : > { %998 = vmatprep.subr.bf16.mxu1 %v1058_v2  ;;  %v555_v29 = vpack.c.bf16 %v474_v27, %v471_v26  ;;  %v466_v30 = vadd.f32 %v912_v23, %v465_v28 }
  0xe1   : > { %v571_v31 = vsel %vm507_vm2, %v555_v29, 0  ;;  %v554_v34 = vpack.c.bf16 %v466_v30, %v463_v33 }
  0xe2   : > { %981 = vmatpush3.bf16.xpose.msra.mxu0 %v571_v31 }
  0xe3   : > { %982 = vmatprep.subr.bf16.mxu0 %v1058_v2  ;;  %v568_v36 = vsel %vm507_vm2, %v554_v34, 0 }
  0xe5   : > { %995 = vmatmul.mubr.msk.bf16.vlgmr.msra.gmra.mxu1 %vm507_vm2, %v557_v32 }
  0xe6   : > { %999 = vmatpush3.bf16.msra.mxu1 %v556_v22  ;;  %1000 = vmatprep.mubr.msk.bf16.mxu1 %vm1059_vm0, %v1058_v2  ;;  %v931_v22 = vld [vmem:[%s1216_s8] ss:$0 sm:$0xff] }
  0xe7   : > { %1004 = vmatprep.subr.bf16.mxu1 %v1058_v2 }
  0xea   : > { %983 = vmatpush3.bf16.xpose.msra.mxu0 %v568_v36 }
  0xeb   : > { %984 = vmatprep.subr.bf16.mxu0 %v1058_v2 }
  0xf2   : > { %985 = vmatpush3.bf16.xpose.msra.mxu0 %v565_v40 }
  0xf3   : > { %986 = vmatprep.subr.bf16.mxu0 %v1058_v2 }
  0xfa   : > { %987 = vmatpush3.bf16.xpose.msra.mxu0 %v562_v43 }
  0xfb   : > { %1016 = vmatprep.subr.bf16.mxu0 %v1058_v2 }
 0x101   : > { %989 = vmatmul.mubr.msk.bf16.vlgmr.msra.gmra.mxu0 %vm507_vm2, %v557_v32 }
 0x102   : > { %1020 = vmatprep.mubr.msk.bf16.mxu0 %vm1059_vm0, %v1058_v2  ;;  %1017 = vmatpush3.bf16.msra.mxu0 %v1042_v6 }
 0x103   : > { %1018 = vmatprep.subr.bf16.mxu0 %v1058_v2 }
 0x106   : > { %1019 = vmatpush3.bf16.msra.mxu0 %v1043_v7 }
 0x1a5   : > { %v651_v44 = vpop.f32.mrf.mxu1 }
 0x1a6   : > { %v657_v49 = vmul.f32 0.17677669, %v651_v44 }
 0x1a7   : > { %v996_v45 = vpop.f32.mrf.mxu1 }
 0x1a8   : > { %v662_v54 = vsel %vm399_vm1, %v657_v49, -inf }
 0x1a9   : > { %v654_v46 = vpop.f32.mrf.mxu1 }
 0x1ab   : > { %v997_v47 = vpop.f32.mrf.mxu1 }
 0x1c1   : > { %v607_v48 = vpop.f32.mrf.mxu0 }
 0x1c2   : > { %v613_v50 = vmul.f32 0.17677669, %v607_v48 }
 0x1c3   : > { %v990_v51 = vpop.f32.mrf.mxu0 }
 0x1c4   : > { %v659_v52 = vsel %vm658_vm3, %v613_v50, -inf }
 0x1c5   : > { %660 = vmax.xlane.f32.xlu0 %v659_v52  ;;  %v610_v53 = vpop.f32.mrf.mxu0 }
 0x1c7   : > { %v991_v55 = vpop.f32.mrf.mxu0 }
 0x1c9   : > { %663 = vmax.xlane.f32.xlu0 %v662_v54 }
 0x24e   : > { %v661_v56 = vpop.xlane.xlu0 %660 }
 0x252   : > { %v664_v57 = vpop.xlane.xlu0 %663 }
 0x253   : > { %v665_v58 = vmax.f32 %v661_v56, %v664_v57 }
 0x255   : > { %v666_v59 = vsub.f32 %v613_v50, %v665_v58  ;;  %v669_v60 = vsub.f32 %v657_v49, %v665_v58 }
 0x257   : > { %v667_v61 = vmul.f32 1.442695, %v666_v59  ;;  %v670_v62 = vmul.f32 1.442695, %v669_v60 }
 0x259   : > { %1044 = vpow2.f32 %v667_v61 }
 0x25a   : > { %1046 = vpow2.f32 %v670_v62 }
 0x266   : > { %v1045_v63 = vpop.eup %1044 }
 0x267   : > { %v1047_v0 = vpop.eup %1046  ;;  %v672_v1 = vsel %vm658_vm3, %v1045_v63, 0.0  ;;  %v679_v5 = vpack.c.bf16 %v1045_v63, %v1045_v63 }
 0x268   : > { %673 = vadd.xlane.f32.xlu1 %v672_v1  ;;  %v680_v3 = vpack.c.bf16 %v1047_v0, %v1047_v0  ;;  %v675_v4 = vsel %vm399_vm1, %v1047_v0, 0.0 }
 0x26a   : > { %1001 = vmatmul.mubr.msk.bf16.vlgmr.msra.gmra.mxu1 %vm399_vm1, %v680_v3 }
 0x26b   : > { %1005 = vmatpush3.bf16.msra.mxu1 %v555_v29  ;;  %1012 = vmatprep.mubr.msk.bf16.mxu1 %vm1059_vm0, %v1058_v2 }
 0x26c   : > { %1006 = vmatprep.subr.bf16.mxu1 %v1058_v2  ;;  %676 = vadd.xlane.f32.xlu1 %v675_v4 }
 0x26f   : > { %1007 = vmatpush3.bf16.msra.mxu1 %v554_v34 }
 0x270   : > { %1008 = vmatprep.subr.bf16.mxu1 %v1058_v2 }
 0x273   : > { %1009 = vmatpush3.bf16.msra.mxu1 %v553_v38 }
 0x274   : > { %1010 = vmatprep.subr.bf16.mxu1 %v1058_v2 }
 0x277   : > { %1011 = vmatpush3.bf16.msra.mxu1 %v552_v42 }
 0x27a   : > { %1013 = vmatmul.mubr.msk.bf16.vlgmr.msra.gmra.mxu1 %vm658_vm3, %v679_v5 }
 0x2f1   : > { %v674_v8 = vpop.xlane.xlu1 %673 }
 0x2f5   : > { %v677_v9 = vpop.xlane.xlu1 %676 }
 0x2f6   : > { %v678_v11 = vadd.f32 %v677_v9, %v674_v8 }
 0x2f8   : > { %1048 = vrcp.f32 %v678_v11 }
 0x305   : > { %v1049_v17 = vpop.eup %1048 }
 0x32a   : > { %v718_v10 = vpop.f32.mrf.mxu1 }
 0x32c   : > { %v1002_v12 = vpop.f32.mrf.mxu1 }
 0x32e   : > { %v721_v13 = vpop.f32.mrf.mxu1 }
 0x330   : > { %v1003_v14 = vpop.f32.mrf.mxu1 }
 0x33a   : > { %v761_v15 = vpop.f32.mrf.mxu1 }
 0x33b   : > { %v762_v16 = vadd.f32 %v761_v15, %v718_v10 }
 0x33c   : > { %v1014_v18 = vpop.f32.mrf.mxu1 }
 0x33d   : > { %v768_v2 = vmul.f32 %v1049_v17, %v762_v16 }
 0x33e   : > { %v764_v19 = vpop.f32.mrf.mxu1 }
 0x33f   : > { %v769_v20 = vpack.c.bf16 %v768_v2, %v768_v2 }
 0x340   : > { %v1015_v21 = vpop.f32.mrf.mxu1 }
 0x341   : > { %1021 = vmatmul.mubr.msk.bf16.vlgmr.msra.gmra.mxu0 %vm507_vm2, %v769_v20 }
 0x401   : > { %v830_v23 = vpop.f32.mrf.mxu0 }
 0x402   : > { %v831_v24 = vadd.f32 %v931_v22, %v830_v23 }
 0x403   : > { %v1022_v25 = vpop.f32.mrf.mxu0 }
 0x404   : > { %836 = vst [vmem:[%s354_s23] sm:$0xff] %v831_v24 }
 0x405   : > { %v833_v26 = vpop.f32.mrf.mxu0 }
 0x407   : > { %v1023_v27 = vpop.f32.mrf.mxu0 }
 0x408 PF: > { %s19_s30 = sadd.s32 1, %s1056_s30  }
 0x409   : > { %p16_p6 = scmp.ge.s32.totalorder %s19_s30, 4  }
 0x40b   :  { %18 = sbr.rel (!%p16_p6) target bundleno = 1 (0x1), region = 89 }

</bundles_post_ra>
